<compile_context>
chip_gen: v5e
topology: v5e:2x2
jax: 0.10.0
libtpu: 0.0.40
codegen_flags: <defaults>
</compile_context>

<pallas_src>
import jax
import jax.numpy as jnp
import numpy as np
from jax.experimental import pallas as pl
from jax.experimental.pallas import tpu as pltpu


def _make_kernel(H, W, Bt, C):
    HW = H * W
    M = 2 + H + W                      # cat columns: [avg | x_h (H) | x_w (W) | max]
    BtC = Bt * C
    taps = [(di, dj) for di in (-1, 0, 1) for dj in (-1, 0, 1)]

    def kernel(x_ref, w10_ref, w11_ref, bns_ref, bnb_ref,
               pool_ref, emat_ref, wm_ref, o_ref):
        f32 = jnp.float32
        bf16 = jnp.bfloat16

        x3 = x_ref[...].astype(f32)                            # (Bt, C, HW) lane-dense
        x = x3.reshape(BtC, HW)                                # flat slab (no-copy: C%8==0)

        # ---- all mean reductions in one MXU matmul: [avg | x_h | x_w] ----
        pooled = jnp.dot(x.astype(bf16), pool_ref[...],
                         preferred_element_type=f32)           # (BtC, 1+H+W)
        mx = jnp.max(x, axis=1, keepdims=True)                 # (BtC, 1) global max-pool
        cat = jnp.concatenate([pooled, mx], axis=1)            # (BtC, M)

        # ---- fused 1x1-conv MLP (block-diag over batch; channel + coord branches) ----
        y = jnp.dot(w10_ref[...], cat.astype(bf16),
                    preferred_element_type=f32)                # (Bt*Cr, M)
        y = jnp.maximum(y * bns_ref[...] + bnb_ref[...], 0.0)  # eval-BN (coord cols) + ReLU
        z = jnp.dot(w11_ref[...], y.astype(bf16),
                    preferred_element_type=f32)                # (BtC, M)

        f_cb = jax.nn.sigmoid(z[:, 0:1] + z[:, M - 1:M])       # (BtC, 1) channel attention
        s_hw = jax.nn.sigmoid(z[:, 1:1 + H + W])               # (BtC, H+W) coord gates

        # ---- expand coordinate gates to flat layout: one block-diag matmul ----
        exp = jnp.dot(s_hw.astype(bf16), emat_ref[...],
                      preferred_element_type=f32)              # (BtC, 2*HW)
        f_ca = exp[:, :HW] * exp[:, HW:]                       # (BtC, HW) = s_h * s_w

        # ---- spatial attention: 3x3 conv (pad=1) on channel-(mean+max) map ----
        sa = jnp.mean(x3, axis=1) + jnp.max(x3, axis=1)        # (Bt, HW)
        conv = jnp.zeros((Bt, HW), f32)
        for t, (di, dj) in enumerate(taps):
            off = di * W + dj                                  # tap[p] = sa[p + off]
            tap = sa if off == 0 else pltpu.roll(sa, (-off) % HW, axis=1)
            conv = conv + tap * wm_ref[t:t + 1, :]             # w2 weight folded into mask
        f_sa = jax.nn.sigmoid(conv)                            # (Bt, HW)

        # ---- fused lane-dense apply: F = (x * F_cb) * (F_sa + F_ca) ----
        out = (x3 * f_cb.reshape(Bt, C, 1)) * \
              (jnp.expand_dims(f_sa, 1) + f_ca.reshape(Bt, C, HW))
        o_ref[...] = out.astype(o_ref.dtype)

    return kernel


def _pick_block_b(B, max_bt=16):
    """Largest batch tile dividing B, <= max_bt, keeping >=2 grid steps if possible."""
    divisors = [d for d in range(1, B + 1) if B % d == 0 and d <= max_bt]
    two_step = [d for d in divisors if B // d >= 2]
    return max(two_step) if two_step else max(divisors)


@jax.jit
def cb_ca_sa4(x, w10, w11, bn_gamma, bn_beta, bn_mean, bn_var, w2, eps=1e-5):
    """x: (B, C, H, W) f32. w10: (C//r, C). w11: (C, C//r). w2: (3, 3)."""
    B, C, H, W = x.shape
    HW = H * W
    Cr = w10.shape[0]
    M = 2 + H + W
    Bt = _pick_block_b(B)
    bf16 = jnp.bfloat16

    # Fold eval-mode BN into per-channel scale/bias, pre-widened over the MLP columns.
    # Columns [avg | x_h..x_w | max]; avg/max columns get identity (scale 1, bias 0).
    inv_std = 1.0 / jnp.sqrt(bn_var + eps)
    scale = (bn_gamma * inv_std).reshape(Cr, 1).astype(jnp.float32)
    bias = (bn_beta - bn_mean * bn_gamma * inv_std).reshape(Cr, 1).astype(jnp.float32)
    ones_c = jnp.ones((Cr, 1), jnp.float32)
    zeros_c = jnp.zeros((Cr, 1), jnp.float32)
    bns = jnp.concatenate([ones_c, jnp.broadcast_to(scale, (Cr, H + W)), ones_c], axis=1)
    bnb = jnp.concatenate([zeros_c, jnp.broadcast_to(bias, (Cr, H + W)), zeros_c], axis=1)
    bns = jnp.tile(bns, (Bt, 1))                               # (Bt*Cr, M)
    bnb = jnp.tile(bnb, (Bt, 1))                               # (Bt*Cr, M)

    # Block-diagonal (over the batch tile) 1x1-conv weights -> one wide MXU matmul each.
    w10_blk = jnp.kron(jnp.eye(Bt, dtype=w10.dtype), w10).astype(bf16)   # (Bt*Cr, Bt*C)
    w11_blk = jnp.kron(jnp.eye(Bt, dtype=w11.dtype), w11).astype(bf16)   # (Bt*C, Bt*Cr)

    # Static host constants (constant-folded under jit).
    p = np.arange(HW)
    hh, ww = p // W, p % W
    pool = np.zeros((HW, 1 + H + W), np.float32)
    pool[:, 0] = 1.0 / HW             # global average-pool column
    pool[p, 1 + hh] = 1.0 / W         # x_h: mean over W  -> (., H)
    pool[p, 1 + H + ww] = 1.0 / H     # x_w: mean over H  -> (., W)
    expand = np.zeros((H + W, 2 * HW), np.float32)   # block-diag expansion
    expand[hh, p] = 1.0               # s_h[:, h] -> flat position (h, w)  (cols [0, HW))
    expand[H + ww, HW + p] = 1.0      # s_w[:, w] -> flat position (h, w)  (cols [HW, 2HW))
    tap_masks = np.stack([
        ((hh + di >= 0) & (hh + di <= H - 1) & (ww + dj >= 0) & (ww + dj <= W - 1))
        for di in (-1, 0, 1) for dj in (-1, 0, 1)
    ]).astype(np.float32)                                      # (9, HW) tap validity
    wm = w2.reshape(9, 1).astype(jnp.float32) * jnp.asarray(tap_masks)   # fold 3x3 weights

    x_view = x.reshape(B, C, HW)      # lane-dense view (row-major, no data movement)

    out_flat = pl.pallas_call(
        _make_kernel(H, W, Bt, C),
        out_shape=jax.ShapeDtypeStruct((B, C, HW), x.dtype),
        grid=(B // Bt,),
        in_specs=[
            pl.BlockSpec((Bt, C, HW), lambda b: (b, 0, 0)),        # x batch tile
            pl.BlockSpec((Bt * Cr, Bt * C), lambda b: (0, 0)),     # block-diag conv10 w
            pl.BlockSpec((Bt * C, Bt * Cr), lambda b: (0, 0)),     # block-diag conv11 w
            pl.BlockSpec((Bt * Cr, M), lambda b: (0, 0)),          # pre-widened BN scale
            pl.BlockSpec((Bt * Cr, M), lambda b: (0, 0)),          # pre-widened BN bias
            pl.BlockSpec((HW, 1 + H + W), lambda b: (0, 0)),       # pooling matrix
            pl.BlockSpec((H + W, 2 * HW), lambda b: (0, 0)),       # block-diag expansion
            pl.BlockSpec((9, HW), lambda b: (0, 0)),               # weighted 3x3 tap masks
        ],
        out_specs=pl.BlockSpec((Bt, C, HW), lambda b: (b, 0, 0)),
        compiler_params=pltpu.CompilerParams(
            dimension_semantics=("parallel",),        # batch-tile axis -> both v7x TCs
            vmem_limit_bytes=32 * 1024 * 1024),
    )(x_view, w10_blk, w11_blk, bns, bnb,
      jnp.asarray(pool, bf16), jnp.asarray(expand, bf16), wm)

    return out_flat.reshape(B, C, H, W)


def reference(x, w10, w11, gamma, beta, rmean, rvar, w2, eps=1e-5):
    """Pure-JAX reference mirroring the PyTorch CB_CA_SA4 forward (eval-mode BN)."""
    B, C, H, W = x.shape
    conv1x1 = lambda v, w: jnp.einsum('oc,bchw->bohw', w, v)
    avg = jnp.mean(x, axis=(2, 3), keepdims=True)
    mx = jnp.max(x, axis=(2, 3), keepdims=True)
    mlp = lambda v: conv1x1(jnp.maximum(conv1x1(v, w10), 0.0), w11)
    f_cb = jax.nn.sigmoid(mlp(avg) + mlp(mx))
    f = x * f_cb
    sa_in = jnp.mean(x, axis=1, keepdims=True) + jnp.max(x, axis=1, keepdims=True)
    conv = jax.lax.conv_general_dilated(
        sa_in, w2.reshape(1, 1, 3, 3), (1, 1), ((1, 1), (1, 1)),
        dimension_numbers=('NCHW', 'OIHW', 'NCHW'))
    f_sa = jax.nn.sigmoid(conv)
    x_h = jnp.mean(x, axis=3, keepdims=True).transpose(0, 1, 3, 2)
    x_w = jnp.mean(x, axis=2, keepdims=True)
    cat = jnp.concatenate([x_h, x_w], axis=3)
    y = conv1x1(cat, w10)
    scale = gamma / jnp.sqrt(rvar + eps)
    y = y * scale.reshape(1, -1, 1, 1) + (beta - rmean * scale).reshape(1, -1, 1, 1)
    y = jnp.maximum(y, 0.0)
    yh, yw = y[..., :H], y[..., H:]
    s_h = jax.nn.sigmoid(conv1x1(yh.transpose(0, 1, 3, 2), w11))
    s_w = jax.nn.sigmoid(conv1x1(yw, w11))
    f_ca = s_h * s_w
    return f * (f_sa + f_ca)


if __name__ == "__main__":
    B, C, H, W = 8, 32, 16, 16      # channel must be divisible by ratio=16
    ratio = 16
    Cr = C // ratio

    key = jax.random.PRNGKey(0)
    ks = jax.random.split(key, 8)
    x = jax.random.normal(ks[0], (B, C, H, W), jnp.float32)
    w10 = 0.2 * jax.random.normal(ks[1], (Cr, C), jnp.float32)    # conv10 (1x1, no bias)
    w11 = 0.2 * jax.random.normal(ks[2], (C, Cr), jnp.float32)    # conv11 (1x1, no bias)
    gamma = 1.0 + 0.1 * jax.random.normal(ks[3], (Cr,), jnp.float32)
    beta = 0.1 * jax.random.normal(ks[4], (Cr,), jnp.float32)
    rmean = 0.1 * jax.random.normal(ks[5], (Cr,), jnp.float32)
    rvar = 0.5 + jax.random.uniform(ks[6], (Cr,), jnp.float32)
    w2 = 0.3 * jax.random.normal(ks[7], (3, 3), jnp.float32)      # conv2 (3x3, 1->1 ch)

    out = cb_ca_sa4(x, w10, w11, gamma, beta, rmean, rvar, w2)
    out = jax.block_until_ready(out)

    ref = reference(x, w10, w11, gamma, beta, rmean, rvar, w2)
    np.testing.assert_allclose(np.asarray(out), np.asarray(ref), rtol=2e-2, atol=2e-2)
    print("KERNEL_OK")
</pallas_src>

<mosaic_0001>
module attributes {stable_mosaic.version = 11 : i64} {
  func.func @kernel(%arg0: i32, %arg1: memref<4x32x256xf32, #tpu.memory_space<vmem>>, %arg2: memref<8x128xbf16, #tpu.memory_space<vmem>>, %arg3: memref<128x8xbf16, #tpu.memory_space<vmem>>, %arg4: memref<8x34xf32, #tpu.memory_space<vmem>>, %arg5: memref<8x34xf32, #tpu.memory_space<vmem>>, %arg6: memref<256x33xbf16, #tpu.memory_space<vmem>>, %arg7: memref<32x512xbf16, #tpu.memory_space<vmem>>, %arg8: memref<9x256xf32, #tpu.memory_space<vmem>>, %arg9: memref<4x32x256xf32, #tpu.memory_space<vmem>>) attributes {dimension_semantics = [#tpu.dimension_semantics<parallel>], iteration_bounds = array<i64: 2>, scalar_prefetch = 0 : i64, scratch_operands = 0 : i64, tpu.core_type = #tpu.core_type<tc>, window_params = [{transform_indices = @transform_0, window_bounds = array<i64: 4, 32, 256>}, {pipeline_mode = #tpu.pipeline_mode<synchronous>, transform_indices = @transform_1, window_bounds = array<i64: 8, 128>}, {pipeline_mode = #tpu.pipeline_mode<synchronous>, transform_indices = @transform_2, window_bounds = array<i64: 128, 8>}, {pipeline_mode = #tpu.pipeline_mode<synchronous>, transform_indices = @transform_3, window_bounds = array<i64: 8, 34>}, {pipeline_mode = #tpu.pipeline_mode<synchronous>, transform_indices = @transform_4, window_bounds = array<i64: 8, 34>}, {pipeline_mode = #tpu.pipeline_mode<synchronous>, transform_indices = @transform_5, window_bounds = array<i64: 256, 33>}, {pipeline_mode = #tpu.pipeline_mode<synchronous>, transform_indices = @transform_6, window_bounds = array<i64: 32, 512>}, {pipeline_mode = #tpu.pipeline_mode<synchronous>, transform_indices = @transform_7, window_bounds = array<i64: 9, 256>}, {transform_indices = @transform_8, window_bounds = array<i64: 4, 32, 256>}]} {
    %c0 = arith.constant 0 : index
    %c0_0 = arith.constant 0 : index
    %c0_1 = arith.constant 0 : index
    %0 = vector.load %arg1[%c0, %c0_0, %c0_1] : memref<4x32x256xf32, #tpu.memory_space<vmem>>, vector<4x32x256xf32>
    %1 = vector.shape_cast %0 : vector<4x32x256xf32> to vector<128x256xf32>
    %2 = arith.truncf %1 : vector<128x256xf32> to vector<128x256xbf16>
    %c0_2 = arith.constant 0 : index
    %c0_3 = arith.constant 0 : index
    %3 = vector.load %arg6[%c0_2, %c0_3] : memref<256x33xbf16, #tpu.memory_space<vmem>>, vector<256x33xbf16>
    %cst = arith.constant dense<0.000000e+00> : vector<128x33xf32>
    %4 = tpu.matmul %2, %3, %cst {dimension_numbers = #tpu.dot_dimension_numbers<[1], [0], [0], [1], [0, 0, 1, 1], [], []>} : vector<128x256xbf16>, vector<256x33xbf16>, vector<128x33xf32> -> vector<128x33xf32>
    %cst_4 = arith.constant dense<0xFF800000> : vector<128xf32>
    %5 = vector.multi_reduction <maximumf>, %1, %cst_4 [1] : vector<128x256xf32> to vector<128xf32>
    %6 = vector.shape_cast %5 : vector<128xf32> to vector<128x1xf32>
    %7 = tpu.concatenate %4, %6 in 1 : vector<128x33xf32>, vector<128x1xf32> -> vector<128x34xf32>
    %c0_5 = arith.constant 0 : index
    %c0_6 = arith.constant 0 : index
    %8 = vector.load %arg2[%c0_5, %c0_6] : memref<8x128xbf16, #tpu.memory_space<vmem>>, vector<8x128xbf16>
    %9 = arith.truncf %7 : vector<128x34xf32> to vector<128x34xbf16>
    %cst_7 = arith.constant dense<0.000000e+00> : vector<8x34xf32>
    %10 = tpu.matmul %8, %9, %cst_7 {dimension_numbers = #tpu.dot_dimension_numbers<[1], [0], [0], [1], [0, 0, 1, 1], [], []>} : vector<8x128xbf16>, vector<128x34xbf16>, vector<8x34xf32> -> vector<8x34xf32>
    %c0_8 = arith.constant 0 : index
    %c0_9 = arith.constant 0 : index
    %11 = vector.load %arg4[%c0_8, %c0_9] : memref<8x34xf32, #tpu.memory_space<vmem>>, vector<8x34xf32>
    %12 = arith.mulf %10, %11 : vector<8x34xf32>
    %c0_10 = arith.constant 0 : index
    %c0_11 = arith.constant 0 : index
    %13 = vector.load %arg5[%c0_10, %c0_11] : memref<8x34xf32, #tpu.memory_space<vmem>>, vector<8x34xf32>
    %14 = arith.addf %12, %13 : vector<8x34xf32>
    %cst_12 = arith.constant 0.000000e+00 : f32
    %15 = vector.broadcast %cst_12 : f32 to vector<8x34xf32>
    %16 = arith.maximumf %14, %15 : vector<8x34xf32>
    %c0_13 = arith.constant 0 : index
    %c0_14 = arith.constant 0 : index
    %17 = vector.load %arg3[%c0_13, %c0_14] : memref<128x8xbf16, #tpu.memory_space<vmem>>, vector<128x8xbf16>
    %18 = arith.truncf %16 : vector<8x34xf32> to vector<8x34xbf16>
    %cst_15 = arith.constant dense<0.000000e+00> : vector<128x34xf32>
    %19 = tpu.matmul %17, %18, %cst_15 {dimension_numbers = #tpu.dot_dimension_numbers<[1], [0], [0], [1], [0, 0, 1, 1], [], []>} : vector<128x8xbf16>, vector<8x34xbf16>, vector<128x34xf32> -> vector<128x34xf32>
    %20 = vector.extract_strided_slice %19 {offsets = [0, 0], sizes = [128, 1], strides = [1, 1]} : vector<128x34xf32> to vector<128x1xf32>
    %21 = vector.extract_strided_slice %19 {offsets = [0, 33], sizes = [128, 1], strides = [1, 1]} : vector<128x34xf32> to vector<128x1xf32>
    %22 = arith.addf %20, %21 : vector<128x1xf32>
    %23 = arith.negf %22 : vector<128x1xf32>
    %24 = math.exp %23 : vector<128x1xf32>
    %cst_16 = arith.constant 1.000000e+00 : f32
    %25 = vector.broadcast %cst_16 : f32 to vector<128x1xf32>
    %26 = arith.addf %25, %24 : vector<128x1xf32>
    %27 = arith.divf %25, %26 : vector<128x1xf32>
    %28 = vector.extract_strided_slice %19 {offsets = [0, 1], sizes = [128, 32], strides = [1, 1]} : vector<128x34xf32> to vector<128x32xf32>
    %29 = arith.negf %28 : vector<128x32xf32>
    %30 = math.exp %29 : vector<128x32xf32>
    %cst_17 = arith.constant 1.000000e+00 : f32
    %31 = vector.broadcast %cst_17 : f32 to vector<128x32xf32>
    %32 = arith.addf %31, %30 : vector<128x32xf32>
    %33 = arith.divf %31, %32 : vector<128x32xf32>
    %34 = arith.truncf %33 : vector<128x32xf32> to vector<128x32xbf16>
    %c0_18 = arith.constant 0 : index
    %c0_19 = arith.constant 0 : index
    %35 = vector.load %arg7[%c0_18, %c0_19] : memref<32x512xbf16, #tpu.memory_space<vmem>>, vector<32x512xbf16>
    %cst_20 = arith.constant dense<0.000000e+00> : vector<128x512xf32>
    %36 = tpu.matmul %34, %35, %cst_20 {dimension_numbers = #tpu.dot_dimension_numbers<[1], [0], [0], [1], [0, 0, 1, 1], [], []>} : vector<128x32xbf16>, vector<32x512xbf16>, vector<128x512xf32> -> vector<128x512xf32>
    %37 = vector.extract_strided_slice %36 {offsets = [0, 0], sizes = [128, 256], strides = [1, 1]} : vector<128x512xf32> to vector<128x256xf32>
    %38 = vector.extract_strided_slice %36 {offsets = [0, 256], sizes = [128, 256], strides = [1, 1]} : vector<128x512xf32> to vector<128x256xf32>
    %39 = arith.mulf %37, %38 : vector<128x256xf32>
    %cst_21 = arith.constant dense<0.000000e+00> : vector<4x256xf32>
    %40 = vector.multi_reduction <add>, %0, %cst_21 [1] : vector<4x32x256xf32> to vector<4x256xf32>
    %cst_22 = arith.constant 3.200000e+01 : f32
    %41 = vector.broadcast %cst_22 : f32 to vector<4x256xf32>
    %42 = arith.divf %40, %41 : vector<4x256xf32>
    %cst_23 = arith.constant dense<0xFF800000> : vector<4x256xf32>
    %43 = vector.multi_reduction <maximumf>, %0, %cst_23 [1] : vector<4x32x256xf32> to vector<4x256xf32>
    %44 = arith.addf %42, %43 : vector<4x256xf32>
    %cst_24 = arith.constant 0.000000e+00 : f32
    %45 = vector.broadcast %cst_24 : f32 to vector<4x256xf32>
    %c17_i32 = arith.constant 17 : i32
    %46 = tpu.dynamic_rotate %44 by %c17_i32 dim 1 : vector<4x256xf32>, i32 -> vector<4x256xf32>
    %c0_25 = arith.constant 0 : index
    %c0_26 = arith.constant 0 : index
    %47 = vector.load %arg8[%c0_25, %c0_26] : memref<9x256xf32, #tpu.memory_space<vmem>>, vector<1x256xf32>
    %48 = vector.broadcast %47 : vector<1x256xf32> to vector<4x256xf32>
    %49 = arith.mulf %46, %48 : vector<4x256xf32>
    %50 = arith.addf %45, %49 : vector<4x256xf32>
    %c16_i32 = arith.constant 16 : i32
    %51 = tpu.dynamic_rotate %44 by %c16_i32 dim 1 : vector<4x256xf32>, i32 -> vector<4x256xf32>
    %c1 = arith.constant 1 : index
    %c0_27 = arith.constant 0 : index
    %52 = vector.load %arg8[%c1, %c0_27] : memref<9x256xf32, #tpu.memory_space<vmem>>, vector<1x256xf32>
    %53 = vector.broadcast %52 : vector<1x256xf32> to vector<4x256xf32>
    %54 = arith.mulf %51, %53 : vector<4x256xf32>
    %55 = arith.addf %50, %54 : vector<4x256xf32>
    %c15_i32 = arith.constant 15 : i32
    %56 = tpu.dynamic_rotate %44 by %c15_i32 dim 1 : vector<4x256xf32>, i32 -> vector<4x256xf32>
    %c2 = arith.constant 2 : index
    %c0_28 = arith.constant 0 : index
    %57 = vector.load %arg8[%c2, %c0_28] : memref<9x256xf32, #tpu.memory_space<vmem>>, vector<1x256xf32>
    %58 = vector.broadcast %57 : vector<1x256xf32> to vector<4x256xf32>
    %59 = arith.mulf %56, %58 : vector<4x256xf32>
    %60 = arith.addf %55, %59 : vector<4x256xf32>
    %c1_i32 = arith.constant 1 : i32
    %61 = tpu.dynamic_rotate %44 by %c1_i32 dim 1 : vector<4x256xf32>, i32 -> vector<4x256xf32>
    %c3 = arith.constant 3 : index
    %c0_29 = arith.constant 0 : index
    %62 = vector.load %arg8[%c3, %c0_29] : memref<9x256xf32, #tpu.memory_space<vmem>>, vector<1x256xf32>
    %63 = vector.broadcast %62 : vector<1x256xf32> to vector<4x256xf32>
    %64 = arith.mulf %61, %63 : vector<4x256xf32>
    %65 = arith.addf %60, %64 : vector<4x256xf32>
    %c4 = arith.constant 4 : index
    %c0_30 = arith.constant 0 : index
    %66 = vector.load %arg8[%c4, %c0_30] : memref<9x256xf32, #tpu.memory_space<vmem>>, vector<1x256xf32>
    %67 = vector.broadcast %66 : vector<1x256xf32> to vector<4x256xf32>
    %68 = arith.mulf %44, %67 : vector<4x256xf32>
    %69 = arith.addf %65, %68 : vector<4x256xf32>
    %c255_i32 = arith.constant 255 : i32
    %70 = tpu.dynamic_rotate %44 by %c255_i32 dim 1 : vector<4x256xf32>, i32 -> vector<4x256xf32>
    %c5 = arith.constant 5 : index
    %c0_31 = arith.constant 0 : index
    %71 = vector.load %arg8[%c5, %c0_31] : memref<9x256xf32, #tpu.memory_space<vmem>>, vector<1x256xf32>
    %72 = vector.broadcast %71 : vector<1x256xf32> to vector<4x256xf32>
    %73 = arith.mulf %70, %72 : vector<4x256xf32>
    %74 = arith.addf %69, %73 : vector<4x256xf32>
    %c241_i32 = arith.constant 241 : i32
    %75 = tpu.dynamic_rotate %44 by %c241_i32 dim 1 : vector<4x256xf32>, i32 -> vector<4x256xf32>
    %c6 = arith.constant 6 : index
    %c0_32 = arith.constant 0 : index
    %76 = vector.load %arg8[%c6, %c0_32] : memref<9x256xf32, #tpu.memory_space<vmem>>, vector<1x256xf32>
    %77 = vector.broadcast %76 : vector<1x256xf32> to vector<4x256xf32>
    %78 = arith.mulf %75, %77 : vector<4x256xf32>
    %79 = arith.addf %74, %78 : vector<4x256xf32>
    %c240_i32 = arith.constant 240 : i32
    %80 = tpu.dynamic_rotate %44 by %c240_i32 dim 1 : vector<4x256xf32>, i32 -> vector<4x256xf32>
    %c7 = arith.constant 7 : index
    %c0_33 = arith.constant 0 : index
    %81 = vector.load %arg8[%c7, %c0_33] : memref<9x256xf32, #tpu.memory_space<vmem>>, vector<1x256xf32>
    %82 = vector.broadcast %81 : vector<1x256xf32> to vector<4x256xf32>
    %83 = arith.mulf %80, %82 : vector<4x256xf32>
    %84 = arith.addf %79, %83 : vector<4x256xf32>
    %c239_i32 = arith.constant 239 : i32
    %85 = tpu.dynamic_rotate %44 by %c239_i32 dim 1 : vector<4x256xf32>, i32 -> vector<4x256xf32>
    %c8 = arith.constant 8 : index
    %c0_34 = arith.constant 0 : index
    %86 = vector.load %arg8[%c8, %c0_34] : memref<9x256xf32, #tpu.memory_space<vmem>>, vector<1x256xf32>
    %87 = vector.broadcast %86 : vector<1x256xf32> to vector<4x256xf32>
    %88 = arith.mulf %85, %87 : vector<4x256xf32>
    %89 = arith.addf %84, %88 : vector<4x256xf32>
    %90 = arith.negf %89 : vector<4x256xf32>
    %91 = math.exp %90 : vector<4x256xf32>
    %cst_35 = arith.constant 1.000000e+00 : f32
    %92 = vector.broadcast %cst_35 : f32 to vector<4x256xf32>
    %93 = arith.addf %92, %91 : vector<4x256xf32>
    %94 = arith.divf %92, %93 : vector<4x256xf32>
    %95 = vector.shape_cast %27 : vector<128x1xf32> to vector<4x32x1xf32>
    %96 = vector.broadcast %95 : vector<4x32x1xf32> to vector<4x32x256xf32>
    %97 = arith.mulf %0, %96 : vector<4x32x256xf32>
    %98 = vector.shape_cast %94 : vector<4x256xf32> to vector<4x1x256xf32>
    %99 = vector.shape_cast %39 : vector<128x256xf32> to vector<4x32x256xf32>
    %100 = vector.broadcast %98 : vector<4x1x256xf32> to vector<4x32x256xf32>
    %101 = arith.addf %100, %99 : vector<4x32x256xf32>
    %102 = arith.mulf %97, %101 : vector<4x32x256xf32>
    %c0_36 = arith.constant 0 : index
    %c0_37 = arith.constant 0 : index
    %c0_38 = arith.constant 0 : index
    %103 = vector.load %arg9[%c0_36, %c0_37, %c0_38] : memref<4x32x256xf32, #tpu.memory_space<vmem>>, vector<4x32x256xf32>
    tpu.vector_store %arg9[%c0_36, %c0_37, %c0_38], %102 {strides = array<i32>} : memref<4x32x256xf32, #tpu.memory_space<vmem>>, vector<4x32x256xf32>,
    return
  }
  func.func @transform_0(%arg0: i32) -> (i32, i32, i32) {
    %c0_i32 = arith.constant 0 : i32
    %c0_i32_0 = arith.constant 0 : i32
    %c0_i32_1 = arith.constant 0 : i32
    return %arg0, %c0_i32, %c0_i32_0 : i32, i32, i32
  }
  func.func @transform_1(%arg0: i32) -> (i32, i32) {
    %c0_i32 = arith.constant 0 : i32
    %c0_i32_0 = arith.constant 0 : i32
    %c0_i32_1 = arith.constant 0 : i32
    return %c0_i32, %c0_i32_0 : i32, i32
  }
  func.func @transform_2(%arg0: i32) -> (i32, i32) {
    %c0_i32 = arith.constant 0 : i32
    %c0_i32_0 = arith.constant 0 : i32
    %c0_i32_1 = arith.constant 0 : i32
    return %c0_i32, %c0_i32_0 : i32, i32
  }
  func.func @transform_3(%arg0: i32) -> (i32, i32) {
    %c0_i32 = arith.constant 0 : i32
    %c0_i32_0 = arith.constant 0 : i32
    %c0_i32_1 = arith.constant 0 : i32
    return %c0_i32, %c0_i32_0 : i32, i32
  }
  func.func @transform_4(%arg0: i32) -> (i32, i32) {
    %c0_i32 = arith.constant 0 : i32
    %c0_i32_0 = arith.constant 0 : i32
    %c0_i32_1 = arith.constant 0 : i32
    return %c0_i32, %c0_i32_0 : i32, i32
  }
  func.func @transform_5(%arg0: i32) -> (i32, i32) {
    %c0_i32 = arith.constant 0 : i32
    %c0_i32_0 = arith.constant 0 : i32
    %c0_i32_1 = arith.constant 0 : i32
    return %c0_i32, %c0_i32_0 : i32, i32
  }
  func.func @transform_6(%arg0: i32) -> (i32, i32) {
    %c0_i32 = arith.constant 0 : i32
    %c0_i32_0 = arith.constant 0 : i32
    %c0_i32_1 = arith.constant 0 : i32
    return %c0_i32, %c0_i32_0 : i32, i32
  }
  func.func @transform_7(%arg0: i32) -> (i32, i32) {
    %c0_i32 = arith.constant 0 : i32
    %c0_i32_0 = arith.constant 0 : i32
    %c0_i32_1 = arith.constant 0 : i32
    return %c0_i32, %c0_i32_0 : i32, i32
  }
  func.func @transform_8(%arg0: i32) -> (i32, i32, i32) {
    %c0_i32 = arith.constant 0 : i32
    %c0_i32_0 = arith.constant 0 : i32
    %c0_i32_1 = arith.constant 0 : i32
    return %arg0, %c0_i32, %c0_i32_0 : i32, i32, i32
  }
}

</mosaic_0001>

<bundles_post_ra>
// kernel: mul.39
= control target key start
LH: loop header
LB: loop body
LE: loop exit
PB: predicated region body
PF: predicated region fallthrough
CT: control target
= control target key end

     0   :  { %s30_s8 = smov 3   ;;  %vm7_vm0 = vcmask 23552   ;;  %vm13_vm1 = vcmask 72752   ;;  %vm19_vm2 = vcmask 48152   ;;  %s47_s0 = inlined_call_operand.vmem [shape: f32[3,3], index: 0, kind: input, shape index: {}]   ;;  %s48_s1 = inlined_call_operand.vmem [shape: f32[9], index: 1, kind: output, shape index: {}]  }
   0x1   :  { %v4_v0 = vld [vmem:[%s47_s0] sm:$0xf]  ;;  %s29_s0 = smov 6  }
   0x2   :  { %5 = vst [vmem:[#allocation1] sm:$0xf] %v4_v0 }
   0x9   :  { %v10_v1 = vld [vmem:[#allocation1 + $0x2] sm:$0x1]   ;;  %v16_v2 = vld [vmem:[#allocation1 + $0x1] sm:$0x1]   ;;  %v6_v3 = vld [vmem:[#allocation1] sm:$0x1]  }
   0xa   :  { %11 = vrot.lane.b32.xlu0 %v10_v1, %s29_s0  ;;  %8 = vst.msk [vmem:[#allocation0] sm:$0x1] %vm7_vm0, %v6_v3  }
  0x12   :  { %17 = vrot.lane.b32.xlu0 %v16_v2, %s30_s8 }
  0x7c   :  { %v12_v4 = vpop.permute.xlu0 %11  }
  0x7d   :  { %14 = vst.msk [vmem:[#allocation0] sm:$0x1] %vm13_vm1, %v12_v4  }
  0x84   :  { %v18_v5 = vpop.permute.xlu0 %17  }
  0x85   :  { %20 = vst.msk [vmem:[#allocation0] sm:$0x1] %vm19_vm2, %v18_v5  }
  0x8c   :  { %v23_v6 = vld [vmem:[#allocation0] sm:$0x1] }
  0x8d   :  { %26 = vst [vmem:[%s48_s1] sm:$0x1] %v23_v6 }

// kernel: cb_ca_sa4.1
= control target key start
LH: loop header
LB: loop body
LE: loop exit
PB: predicated region body
PF: predicated region fallthrough
CT: control target
= control target key end

     0   :  { %s3083_s27 = smov 0   ;;  %s4621_s0 = inlined_call_operand.vmem [shape: f32[8,32,256], index: 0, kind: input, shape index: {}]   ;;  %s4622_s1 = inlined_call_operand.vmem [shape: bf16[8,128], index: 1, kind: input, shape index: {}]   ;;  %s4623_s2 = inlined_call_operand.vmem [shape: bf16[128,8], index: 2, kind: input, shape index: {}]   ;;  %s4624_s3 = inlined_call_operand.vmem [shape: f32[8,34], index: 3, kind: input, shape index: {}]   ;;  %s4625_s4 = inlined_call_operand.vmem [shape: f32[8,34], index: 4, kind: input, shape index: {}]   ;;  %s4626_s5 = inlined_call_operand.vmem [shape: bf16[256,33], index: 5, kind: input, shape index: {}]   ;;  %s4627_s6 = inlined_call_operand.vmem [shape: bf16[32,512], index: 6, kind: input, shape index: {}]   ;;  %s4628_s7 = inlined_call_operand.vmem [shape: f32[9,256], index: 7, kind: input, shape index: {}]   ;;  %s4629_s8 = inlined_call_operand.vmem [shape: f32[8,32,256], index: 8, kind: output, shape index: {}]  }
   0x1 LB: > { %s2538_s28 = sadd.s32 4294967295, %s3025_s27   ;;  %p2542_p0 = scmp.ge.s32.totalorder %s3025_s27, 1  ;;  %s3025_s27 = sphi %s3083_s27, %s18_s27  }
   0x2   : > { %p264_p1 = scmp.lt.s32.totalorder %s3025_s27, 3 }
   0x4   : > { %p265_p2 = pnand %p2542_p0, %p264_p1 }
   0x5   : > { %s2543_s11 = sshll.u32 (!%p265_p2), %s2538_s28, 2  ;;  %s3027_s14 = smov (!%p265_p2), 127  }
   0x6   : > { %268 = sbr.rel (%p265_p2) target bundleno = 1014 (0x3f6), region = 52  ;;  %p301_p3 = scmp.lt.s32.totalorder (!%p265_p2), %s2543_s11, 7 }
   0x7   : > { %s3029_s30 = smov (!%p265_p2), 95   ;;  %s3030_s9 = smov (!%p265_p2), 17  }
   0x8   : > { %s3031_s10 = smov (!%p265_p2), 15   ;;  %s3032_s12 = smov (!%p265_p2), 1  }
   0x9   : > { %s3033_s13 = smov (!%p265_p2), 113   ;;  %s3034_s15 = smov (!%p265_p2), 16  }
   0xa   : > { %s3035_s17 = smov (!%p265_p2), 112  }
   0xb   : > { %v2770_v0 = vld [vmem:[%s4626_s5 + $0x38] sm:$0xff]  ;;  %v2769_v2 = vld [vmem:[%s4626_s5 + $0x30] sm:$0xff]  ;;  %s4673_s11 = smov (!%p301_p3, %s2543_s11), 7  ;;  %v2768_v4 = vld [vmem:[%s4626_s5 + $0x28] sm:$0xff]  ;;  %vm637_vm0 = vcmask 269312   ;;  %vm763_vm1 = vcmask 1043456  }
   0xc   : > { %v3097_v1 = vld [vmem:[%s4626_s5 + $0x78] sm:$0xff]  ;;  %491 = vmatpush.bf16.msra.mxu0 %v2770_v0  ;;  %2795 = vmatpush.bf16.msra.mxu2 %v2770_v0  ;;  %v3106_v3 = vld [vmem:[%s4626_s5 + $0x70] sm:$0xff]  ;;  %s2761_s16 = sshll.u32 %s4673_s11, 6  ;;  %v3117_v5 = vld [vmem:[%s4626_s5 + $0x68] sm:$0xff]  ;;  %vm738_vm2 = vcmask 64512  }
   0xd   : > { %540 = vmatpush.bf16.msra.mxu1 %v3097_v1  ;;  %s3124_s23 = scalar_lea.vmem %s4621_s0, %s2761_s16  ;;  %v2767_v12 = vld [vmem:[%s4626_s5 + $0x20] sm:$0xff]  ;;  %v2766_v20 = vld [vmem:[%s4626_s5 + $0x18] sm:$0xff]  ;;  %v2765_v26 = vld [vmem:[%s4626_s5 + $0x10] sm:$0xff]  ;;  %s4468_s19 = scalar_lea.vmem %s4629_s8, %s2761_s16 }
   0xe   : > { %v3128_v6 = vld [vmem:[%s3124_s23 + $0xe0] sm:$0xff]  ;;  %v3131_v7 = vld [vmem:[%s3124_s23 + $0xe8] sm:$0xff]  ;;  %v3153_v14 = vld [vmem:[%s3124_s23 + $0xf0] sm:$0xff] }
   0xf   : > { %v3134_v8 = vld [vmem:[%s3124_s23 + $0xa0] sm:$0xff]  ;;  %v631_v9 = vmax.f32 %v3128_v6, %v3131_v7  ;;  %v3139_v10 = vld [vmem:[%s3124_s23 + $0xa8] sm:$0xff]  ;;  %v3156_v15 = vld [vmem:[%s3124_s23 + $0xf8] sm:$0xff] }
  0x10   : > { %492 = vmatpush.bf16.msra.mxu0 %v2769_v2  ;;  %2796 = vmatpush.bf16.msra.mxu2 %v2769_v2  ;;  %v619_v11 = vmax.f32 %v3134_v8, %v3139_v10  ;;  %v3150_v13 = vld [vmem:[%s4626_s5 + $0x60] sm:$0xff]  ;;  %v3159_v16 = vld [vmem:[%s3124_s23 + $0xb0] sm:$0xff]  ;;  %v3162_v17 = vld [vmem:[%s3124_s23 + $0xb8] sm:$0xff]  ;;  %v634_v23 = vmax.f32 %v3153_v14, %v3156_v15  ;;  %v361_v2 = vpack.c.bf16 %v3153_v14, %v3128_v6 }
  0x11   : > { %541 = vmatpush.bf16.msra.mxu1 %v3106_v3  ;;  %632 = vmax.xlane.f32.xlu0 %v631_v9  ;;  %v3165_v18 = vld [vmem:[%s3124_s23 + $0xc0] sm:$0xff]  ;;  %v3168_v19 = vld [vmem:[%s3124_s23 + $0xc8] sm:$0xff]  ;;  %v3179_v22 = vld [vmem:[%s4626_s5 + $0x58] sm:$0xff]  ;;  %v622_v24 = vmax.f32 %v3159_v16, %v3162_v17 }
  0x12   : > { %620 = vmax.xlane.f32.xlu2 %v619_v11  ;;  %v625_v21 = vmax.f32 %v3165_v18, %v3168_v19  ;;  %v3186_v25 = vld [vmem:[%s3124_s23 + $0xd8] sm:$0xff]  ;;  %v3195_v27 = vld [vmem:[%s4626_s5 + $0x50] sm:$0xff]  ;;  %v3201_v29 = vld [vmem:[%s3124_s23 + $0x80] sm:$0xff] }
  0x13   : > { %v3198_v28 = vld [vmem:[%s3124_s23 + $0xd0] sm:$0xff]  ;;  %v3204_v30 = vld [vmem:[%s3124_s23 + $0x88] sm:$0xff]  ;;  %v3209_v32 = vld [vmem:[%s3124_s23 + $0x60] sm:$0xff]  ;;  %v360_v11 = vpack.c.bf16 %v3186_v25, %v3168_v19 }
  0x14   : > { %493 = vmatpush.bf16.msra.mxu0 %v2768_v4  ;;  %2797 = vmatpush.bf16.msra.mxu2 %v2768_v4  ;;  %v628_v31 = vmax.f32 %v3198_v28, %v3186_v25  ;;  %v3212_v33 = vld [vmem:[%s3124_s23 + $0x68] sm:$0xff]  ;;  %v613_v36 = vmax.f32 %v3201_v29, %v3204_v30  ;;  %v3228_v38 = vld [vmem:[%s3124_s23 + $0x90] sm:$0xff]  ;;  %v3231_v39 = vld [vmem:[%s3124_s23 + $0x98] sm:$0xff]  ;;  %v359_v50 = vpack.c.bf16 %v3198_v28, %v3165_v18 }
  0x15   : > { %542 = vmatpush.bf16.msra.mxu1 %v3117_v5  ;;  %626 = vmax.xlane.f32.xlu1 %v625_v21  ;;  %v2764_v34 = vld [vmem:[%s4626_s5 + $0x8] sm:$0xff]  ;;  %v607_v37 = vmax.f32 %v3209_v32, %v3212_v33  ;;  %v2763_v40 = vld [vmem:[%s4626_s5] sm:$0xff]  ;;  %v3240_v42 = vld [vmem:[%s3124_s23 + $0x10] sm:$0xff]  ;;  %v616_v48 = vmax.f32 %v3228_v38, %v3231_v39 }
  0x16   : > { %v3221_v35 = vld [vmem:[%s4626_s5 + $0x48] sm:$0xff]  ;;  %v3237_v41 = vld [vmem:[%s3124_s23] sm:$0xff]  ;;  %v3250_v45 = vld [vmem:[%s3124_s23 + $0x18] sm:$0xff] }
  0x17   : > { %v2771_v43 = vld [vmem:[%s4626_s5 + $0x40] sm:$0xff]  ;;  %v3247_v44 = vld [vmem:[%s3124_s23 + $0x8] sm:$0xff]  ;;  %v329_v46 = vld [vmem:[%s3124_s23 + $0x70] sm:$0xff]  ;;  %v347_v49 = vpack.c.bf16 %v3240_v42, %v3237_v41  ;;  %v592_v4 = vmax.f32 %v3240_v42, %v3250_v45 }
  0x18   : > { %494 = vmatpush.bf16.msra.mxu0 %v2767_v12  ;;  %2798 = vmatpush.bf16.msra.mxu2 %v2767_v12  ;;  %v330_v47 = vld [vmem:[%s3124_s23 + $0x78] sm:$0xff]  ;;  %v325_v51 = vld [vmem:[%s3124_s23 + $0x50] sm:$0xff]  ;;  %v348_v53 = vpack.c.bf16 %v3250_v45, %v3247_v44  ;;  %v3267_v56 = vld [vmem:[%s3124_s23 + $0x40] sm:$0xff]  ;;  %v589_v62 = vmax.f32 %v3237_v41, %v3247_v44 }
  0x19   : > { %543 = vmatpush.bf16.msra.mxu1 %v3150_v13  ;;  %635 = vmax.xlane.f32.xlu0 %v634_v23  ;;  %v326_v52 = vld [vmem:[%s3124_s23 + $0x58] sm:$0xff]  ;;  %v610_v54 = vmax.f32 %v329_v46, %v330_v47  ;;  %v3270_v57 = vld [vmem:[%s3124_s23 + $0x48] sm:$0xff]  ;;  %v3273_v58 = vld [vmem:[%s3124_s23 + $0x20] sm:$0xff]  ;;  %v351_v9 = vpack.c.bf16 %v325_v51, %v3267_v56  ;;  %v354_v21 = vpack.c.bf16 %v330_v47, %v3212_v33 }
  0x1a   : > { %623 = vmax.xlane.f32.xlu2 %v622_v24  ;;  %v604_v55 = vmax.f32 %v325_v51, %v326_v52  ;;  %v3276_v59 = vld [vmem:[%s3124_s23 + $0x28] sm:$0xff]  ;;  %v601_v60 = vmax.f32 %v3267_v56, %v3270_v57  ;;  %v3286_v63 = vld [vmem:[%s3124_s23 + $0x30] sm:$0xff]  ;;  %v3290_v0 = vld [vmem:[%s3124_s23 + $0x38] sm:$0xff]  ;;  %v352_v12 = vpack.c.bf16 %v326_v52, %v3270_v57  ;;  %v356_v23 = vpack.c.bf16 %v3231_v39, %v3204_v30 }
  0x1b   : > { %v595_v61 = vmax.f32 %v3273_v58, %v3276_v59  ;;  %v357_v24 = vpack.c.bf16 %v3159_v16, %v3134_v8 }
  0x1c   : > { %495 = vmatpush.bf16.msra.mxu0 %v2766_v20  ;;  %2799 = vmatpush.bf16.msra.mxu2 %v2766_v20  ;;  %v362_v20 = vpack.c.bf16 %v3156_v15, %v3131_v7 }
  0x1d   : > { %544 = vmatpush.bf16.msra.mxu1 %v3179_v22  ;;  %629 = vmax.xlane.f32.xlu1 %v628_v31 }
  0x20   : > { %496 = vmatpush.bf16.msra.mxu0 %v2765_v26  ;;  %2800 = vmatpush.bf16.msra.mxu2 %v2765_v26  ;;  %v358_v26 = vpack.c.bf16 %v3162_v17, %v3139_v10 }
  0x21   : > { %545 = vmatpush.bf16.msra.mxu1 %v3195_v27  ;;  %614 = vmax.xlane.f32.xlu0 %v613_v36 }
  0x22   : > { %608 = vmax.xlane.f32.xlu2 %v607_v37 }
  0x24   : > { %497 = vmatpush.bf16.msra.mxu0 %v2764_v34  ;;  %2801 = vmatpush.bf16.msra.mxu2 %v2764_v34 }
  0x25   : > { %546 = vmatpush.bf16.msra.mxu1 %v3221_v35  ;;  %617 = vmax.xlane.f32.xlu1 %v616_v48 }
  0x28   : > { %498 = vmatpush.bf16.msra.mxu0 %v2763_v40  ;;  %2802 = vmatpush.bf16.msra.mxu2 %v2763_v40 }
  0x29   : > { %547 = vmatpush.bf16.msra.mxu1 %v2771_v43  ;;  %611 = vmax.xlane.f32.xlu0 %v610_v54 }
  0x2a   : > { %605 = vmax.xlane.f32.xlu2 %v604_v55 }
  0x2b   : > { %499 = vmatmul.bf16.vlgmr.msra.gmra.mxu0 %v347_v49  ;;  %529 = vmatmul.bf16.vlgmr.msra.gmra.mxu2 %v359_v50 }
  0x2c   : > { %2803 = vmatpush.bf16.msrb.mxu2 %v3097_v1  ;;  %548 = vmatmul.bf16.vlgmr.msra.gmra.mxu1 %v348_v53  ;;  %v349_v1 = vpack.c.bf16 %v3286_v63, %v3273_v58 }
  0x2d   : > { %602 = vmax.xlane.f32.xlu1 %v601_v60 }
  0x30   : > { %2804 = vmatpush.bf16.msrb.mxu2 %v3106_v3  ;;  %v350_v3 = vpack.c.bf16 %v3290_v0, %v3276_v59 }
  0x31   : > { %596 = vmax.xlane.f32.xlu0 %v595_v61 }
  0x32   : > { %590 = vmax.xlane.f32.xlu2 %v589_v62 }
  0x34   : > { %2805 = vmatpush.bf16.msrb.mxu2 %v3117_v5  ;;  %v598_v5 = vmax.f32 %v3286_v63, %v3290_v0 }
  0x36   : > { %599 = vmax.xlane.f32.xlu1 %v598_v5 }
  0x38   : > { %2806 = vmatpush.bf16.msrb.mxu2 %v3150_v13  ;;  %v353_v13 = vpack.c.bf16 %v329_v46, %v3209_v32 }
  0x39   : > { %593 = vmax.xlane.f32.xlu0 %v592_v4 }
  0x3b   : > { %504 = vmatmul.bf16.gmra.mxu0 %v349_v1  ;;  %534 = vmatmul.bf16.gmra.mxu2 %v361_v2 }
  0x3c   : > { %2807 = vmatpush.bf16.msrb.mxu2 %v3179_v22  ;;  %553 = vmatmul.bf16.gmra.mxu1 %v350_v3  ;;  %v355_v22 = vpack.c.bf16 %v3228_v38, %v3201_v29 }
  0x40   : > { %2808 = vmatpush.bf16.msrb.mxu2 %v3195_v27 }
  0x44   : > { %2809 = vmatpush.bf16.msrb.mxu2 %v3221_v35 }
  0x48   : > { %2810 = vmatpush.bf16.msrb.mxu2 %v2771_v43 }
  0x4b   : > { %509 = vmatmul.bf16.gmra.mxu0 %v351_v9  ;;  %578 = vmatmul.bf16.vlgmr.msrb.gmra.mxu2 %v360_v11 }
  0x4c   : > { %558 = vmatmul.bf16.gmra.mxu1 %v352_v12 }
  0x5b   : > { %514 = vmatmul.bf16.gmra.mxu0 %v353_v13  ;;  %583 = vmatmul.bf16.gmra.mxu2 %v362_v20 }
  0x5c   : > { %563 = vmatmul.bf16.gmra.mxu1 %v354_v21 }
  0x6b   : > { %519 = vmatmul.bf16.gmra.mxu0 %v355_v22 }
  0x6c   : > { %568 = vmatmul.bf16.gmra.mxu1 %v356_v23 }
  0x7b   : > { %524 = vmatmul.bf16.gmra.mxu0 %v357_v24 }
  0x7c   : > { %573 = vmatmul.bf16.gmra.mxu1 %v358_v26 }
  0x84   : > { %v633_v55 = vpop.xlane.xlu0 %632 }
  0x85   : > { %v621_v26 = vpop.xlane.xlu2 %620 }
  0x88   : > { %v627_v61 = vpop.xlane.xlu1 %626 }
  0x8c   : > { %v636_v9 = vpop.xlane.xlu0 %635 }
  0x90   : > { %v630_v22 = vpop.xlane.xlu1 %629 }
  0xa8   : > { %v500_v27 = vpop.f32.mrf.mxu0 }
  0xa9   : > { %v549_v31 = vpop.f32.mrf.mxu1 }
  0xaa   : > { %v3321_v32 = vadd.f32 %v549_v31, %v500_v27 }
  0xae   : > { %v530_v33 = vpop.f32.mrf.mxu2 }
  0xb0   : > { %v3323_v34 = vpop.f32.mrf.mxu0 }
  0xb1   : > { %v3325_v35 = vpop.f32.mrf.mxu1 }
  0xb6   : > { %v532_v36 = vpop.f32.mrf.mxu2 }
  0xb8   : > { %v505_v37 = vpop.f32.mrf.mxu0 }
  0xb9   : > { %v554_v40 = vpop.f32.mrf.mxu1 }
  0xba   : > { %v3327_v43 = vadd.f32 %v554_v40, %v505_v37  ;;  %v615_v40 = vpop.xlane.xlu0 %614 }
  0xbe   : > { %v535_v8 = vpop.f32.mrf.mxu2 }
  0xc0   : > { %v3329_v16 = vpop.f32.mrf.mxu0 }
  0xc1   : > { %v3331_v10 = vpop.f32.mrf.mxu1 }
  0xc6   : > { %v537_v17 = vpop.f32.mrf.mxu2 }
  0xc8   : > { %v510_v46 = vpop.f32.mrf.mxu0 }
  0xc9   : > { %v559_v47 = vpop.f32.mrf.mxu1 }
  0xca   : > { %v3333_v48 = vadd.f32 %v559_v47, %v510_v46  ;;  %v618_v46 = vpop.xlane.xlu1 %617  ;;  %v612_v47 = vpop.xlane.xlu0 %611 }
  0xce   : > { %v579_v49 = vpop.f32.mrf.mxu2 }
  0xcf   : > { %v580_v12 = vadd.f32 %v579_v49, %v530_v33 }
  0xd0   : > { %v512_v50 = vpop.f32.mrf.mxu0 }
  0xd1   : > { %v561_v51 = vpop.f32.mrf.mxu1  ;;  %v650_v27 = vsel %vm637_vm0, %v580_v12, %v627_v61 }
  0xd6   : > { %v581_v52 = vpop.f32.mrf.mxu2 }
  0xd7   : > { %v582_v4 = vadd.f32 %v581_v52, %v532_v36 }
  0xd8   : > { %v515_v53 = vpop.f32.mrf.mxu0 }
  0xd9   : > { %v564_v54 = vpop.f32.mrf.mxu1  ;;  %v651_v24 = vsel %vm637_vm0, %v582_v4, %v630_v22 }
  0xda   : > { %v661_v31 = vpack.c.bf16 %v651_v24, %v650_v27  ;;  %v565_v22 = vadd.f32 %v564_v54, %v515_v53  ;;  %v597_v24 = vpop.xlane.xlu0 %596 }
  0xde   : > { %v584_v60 = vpop.f32.mrf.mxu2 }
  0xdf   : > { %v585_v2 = vadd.f32 %v584_v60, %v535_v8  ;;  %v624_v8 = vpop.xlane.xlu2 %623 }
  0xe0   : > { %v517_v62 = vpop.f32.mrf.mxu0 }
  0xe1   : > { %v566_v1 = vpop.f32.mrf.mxu1  ;;  %v652_v13 = vsel %vm637_vm0, %v585_v2, %v633_v55 }
  0xe6   : > { %v586_v3 = vpop.f32.mrf.mxu2 }
  0xe7   : > { %v587_v5 = vadd.f32 %v586_v3, %v537_v17  ;;  %v609_v55 = vpop.xlane.xlu2 %608 }
  0xe8   : > { %v520_v11 = vpop.f32.mrf.mxu0 }
  0xe9   : > { %v653_v20 = vsel %vm637_vm0, %v587_v5, %v636_v9  ;;  %v569_v21 = vpop.f32.mrf.mxu1  ;;  %v603_v9 = vpop.xlane.xlu1 %602 }
  0xea   : > { %v662_v23 = vpack.c.bf16 %v653_v20, %v652_v13  ;;  %v570_v4 = vadd.f32 %v569_v21, %v520_v11  ;;  %v567_v13 = vadd.f32 %v566_v1, %v517_v62  ;;  %v644_v11 = vsel %vm637_vm0, %v565_v22, %v609_v55 }
  0xeb   : > { %v642_v53 = vsel %vm637_vm0, %v3333_v48, %v603_v9  ;;  %v2784_v9 = vld [vmem:[%s4623_s2 + $0x28] sm:$0xff] }
  0xec   : > { %663 = vmatpush.bf16.msra.mxu2 %v662_v23  ;;  %v646_v23 = vsel %vm637_vm0, %v570_v4, %v615_v40  ;;  %v594_v40 = vpop.xlane.xlu0 %593  ;;  %v2781_v4 = vld [vmem:[%s4623_s2 + $0x10] sm:$0xff] }
  0xf0   : > { %v522_v36 = vpop.f32.mrf.mxu0  ;;  %664 = vmatpush.bf16.msra.mxu2 %v661_v31  ;;  %v562_v31 = vadd.f32 %v561_v51, %v512_v50  ;;  %v552_v50 = vadd.f32 %v3325_v35, %v3323_v34  ;;  %v654_v34 = vld [vmem:[%s4622_s1] sm:$0xf] }
  0xf1   : > { %v571_v37 = vpop.f32.mrf.mxu1  ;;  %v600_v1 = vpop.xlane.xlu1 %599  ;;  %v676_v35 = vld [vmem:[%s4624_s3] sm:$0xff] }
  0xf2   : > { %v572_v2 = vadd.f32 %v571_v37, %v522_v36  ;;  %v645_v36 = vsel %vm637_vm0, %v567_v13, %v612_v47  ;;  %v606_v37 = vpop.xlane.xlu2 %605  ;;  %v2786_v13 = vld [vmem:[%s4623_s2 + $0x38] sm:$0xff] }
  0xf3   : > { %v658_v21 = vpack.c.bf16 %v645_v36, %v644_v11  ;;  %v643_v62 = vsel %vm637_vm0, %v562_v31, %v606_v37 }
  0xf4   : > { %v647_v20 = vsel %vm637_vm0, %v572_v2, %v618_v46  ;;  %v657_v54 = vpack.c.bf16 %v643_v62, %v642_v53  ;;  %v678_v46 = vld [vmem:[%s4625_s4] sm:$0xff] }
  0xf5   : > { %v659_v27 = vpack.c.bf16 %v647_v20, %v646_v23  ;;  %v2779_v2 = vld [vmem:[%s4623_s2] sm:$0xff] }
  0xf8   : > { %v525_v33 = vpop.f32.mrf.mxu0 }
  0xf9   : > { %v574_v17 = vpop.f32.mrf.mxu1 }
  0xfa   : > { %v575_v49 = vadd.f32 %v574_v17, %v525_v33  ;;  %v591_v33 = vpop.xlane.xlu2 %590 }
  0xfb   : > { %v638_v17 = vsel %vm637_vm0, %v3321_v32, %v591_v33 }
  0xfc   : > { %v648_v5 = vsel %vm637_vm0, %v575_v49, %v621_v26  ;;  %v557_v26 = vadd.f32 %v3331_v10, %v3329_v16  ;;  %v639_v10 = vsel %vm637_vm0, %v552_v50, %v594_v40 }
  0xfd   : > { %v655_v48 = vpack.c.bf16 %v639_v10, %v638_v17 }
  0xfe   : > { %v641_v51 = vsel %vm637_vm0, %v557_v26, %v600_v1 }
 0x100   : > { %v527_v52 = vpop.f32.mrf.mxu0 }
 0x101   : > { %v576_v60 = vpop.f32.mrf.mxu1 }
 0x102   : > { %v577_v3 = vadd.f32 %v576_v60, %v527_v52 }
 0x104   : > { %v649_v61 = vsel %vm637_vm0, %v577_v3, %v624_v8  ;;  %v640_v8 = vsel %vm637_vm0, %v3327_v43, %v597_v24  ;;  %v2780_v3 = vld [vmem:[%s4623_s2 + $0x8] sm:$0xff] }
 0x105   : > { %v660_v12 = vpack.c.bf16 %v649_v61, %v648_v5  ;;  %v656_v16 = vpack.c.bf16 %v641_v51, %v640_v8  ;;  %v2782_v5 = vld [vmem:[%s4623_s2 + $0x18] sm:$0xff]  ;;  %v2783_v61 = vld [vmem:[%s4623_s2 + $0x20] sm:$0xff] }
 0x107   : > { %665 = vmatpush.bf16.msra.mxu2 %v660_v12  ;;  %v2785_v12 = vld [vmem:[%s4623_s2 + $0x30] sm:$0xff] }
 0x10b   : > { %666 = vmatpush.bf16.msra.mxu2 %v659_v27 }
 0x10f   : > { %667 = vmatpush.bf16.msra.mxu2 %v658_v21 }
 0x113   : > { %668 = vmatpush.bf16.msra.mxu2 %v657_v54 }
 0x117   : > { %669 = vmatpush.bf16.msra.mxu2 %v656_v16 }
 0x11b   : > { %670 = vmatpush.bf16.msra.mxu2 %v655_v48 }
 0x11e   : > { %671 = vmatmul.bf16.vlgmr.msra.gmra.mxu2 %v654_v34 }
 0x1a1   : > { %v672_v43 = vpop.f32.mrf.mxu2 }
 0x1a2   : > { %v677_v47 = vmul.f32 %v676_v35, %v672_v43 }
 0x1a4   : > { %v679_v49 = vadd.f32 %v678_v46, %v677_v47 }
 0x1a6   : > { %v680_v52 = vmax.f32 %v679_v49, 0.0 }
 0x1a8   : > { %v697_v32 = vpack.c.bf16 %v680_v52, %v680_v52 }
 0x1a9   : > { %v674_v55 = vpop.f32.mrf.mxu2 }
 0x1aa   : > { %v765_v60 = vsel %vm763_vm1, %v697_v32, 0 }
 0x1ab   : > { %774 = vmatpush.bf16.msra.mxu3 %v765_v60 }
 0x1ae   : > { %2645 = vmatmul.msk.bf16.vlgmr.msra.gmra.mxu3 %vm738_vm2, %v2779_v2 }
 0x1be   : > { %2646 = vmatmul.msk.bf16.gmra.mxu3 %vm738_vm2, %v2780_v3 }
 0x1ce   : > { %2647 = vmatmul.msk.bf16.gmra.mxu3 %vm738_vm2, %v2781_v4 }
 0x1de   : > { %2648 = vmatmul.msk.bf16.gmra.mxu3 %vm738_vm2, %v2782_v5 }
 0x1ee   : > { %2649 = vmatmul.msk.bf16.gmra.mxu3 %vm738_vm2, %v2783_v61 }
 0x1fe   : > { %2650 = vmatmul.msk.bf16.gmra.mxu3 %vm738_vm2, %v2784_v9 }
 0x20e   : > { %2651 = vmatmul.msk.bf16.gmra.mxu3 %vm738_vm2, %v2785_v12 }
 0x21e   : > { %2652 = vmatmul.msk.bf16.gmra.mxu3 %vm738_vm2, %v2786_v13  ;;  %v2791_v13 = vld [vmem:[%s4627_s6 + $0x24] sm:$0xf] }
 0x231   : > { %v3391_v20 = vpop.f32.mrf.mxu3 }
 0x232   : > { %v2669_v22 = vmul.f32 -1.442695, %v3391_v20 }
 0x234   : > { %2833 = vpow2.f32 %v2669_v22  ;;  %v2705_v22 = vld [vmem:[%s4627_s6 + $0x30] sm:$0xf0] }
 0x239   : > { %v3394_v23 = vpop.f32.mrf.mxu3 }
 0x23a   : > { %v2834_v24 = vpop.eup %2833  ;;  %v2670_v27 = vmul.f32 -1.442695, %v3394_v23 }
 0x23b   : > { %v1248_v31 = vadd.f32 1.0, %v2834_v24 }
 0x23c   : > { %2835 = vpow2.f32 %v2670_v27 }
 0x23d   : > { %2837 = vrcp.f32 %v1248_v31  ;;  %v1273_v17 = vand.u32 2147483647, %v1248_v31  ;;  %v1275_v48 = vand.u32 2147483648, %v1248_v31  ;;  %vm1269_vm4 = vweird.f32 %v1248_v31 }
 0x23f   : > { %vm1274_vm8 = vcmp.eq.f32.partialorder %v1273_v17, 8.507059e+37  ;;  %v1276_v3 = vor.u32 1.1754944e-38, %v1275_v48 }
 0x241   : > { %v3397_v36 = vpop.f32.mrf.mxu3 }
 0x242   : > { %v2836_v37 = vpop.eup %2835  ;;  %v2671_v11 = vmul.f32 -1.442695, %v3397_v36 }
 0x243   : > { %v2838_v21 = vpop.eup %2837  ;;  %v1249_v26 = vadd.f32 1.0, %v2836_v37 }
 0x244   : > { %2839 = vpow2.f32 %v2671_v11  ;;  %v1265_v62 = vmul.f32 %v2838_v21, %v1248_v31  ;;  %vm1270_vm3 = vweird.f32 %v2838_v21  ;;  %v2708_v31 = vor.u32 %v2791_v13, %v2705_v22 }
 0x245   : > { %2841 = vrcp.f32 %v1249_v26  ;;  %v1290_v34 = vand.u32 2147483648, %v1249_v26  ;;  %v1288_v43 = vand.u32 2147483647, %v1249_v26  ;;  %vm3408_vm6 = vmor %vm1269_vm4, %vm1270_vm3  ;;  %vm1284_vm7 = vweird.f32 %v1249_v26 }
 0x246   : > { %v1266_v1 = vsub.f32 1.0, %v1265_v62  ;;  %1664 = vmatpush.bf16.msrb.mxu3 %v2708_v31 }
 0x247   : > { %v1291_v4 = vor.u32 1.1754944e-38, %v1290_v34  ;;  %vm1289_vm10 = vcmp.eq.f32.partialorder %v1288_v43, 8.507059e+37 }
 0x248   : > { %v1267_v51 = vmul.f32 %v2838_v21, %v1266_v1 }
 0x249   : > { %v3400_v53 = vpop.f32.mrf.mxu3 }
 0x24a   : > { %v2840_v54 = vpop.eup %2839  ;;  %v2672_v50 = vmul.f32 -1.442695, %v3400_v53  ;;  %v1268_v16 = vadd.f32 %v2838_v21, %v1267_v51 }
 0x24b   : > { %v2842_v40 = vpop.eup %2841  ;;  %v3403_v8 = vadd.f32 1.0, %v2840_v54 }
 0x24c   : > { %2843 = vpow2.f32 %v2672_v50  ;;  %v1280_v33 = vmul.f32 %v2842_v40, %v1249_v26  ;;  %vm1285_vm5 = vweird.f32 %v2842_v40  ;;  %v1272_v32 = vsel %vm3408_vm6, %v2838_v21, %v1268_v16 }
 0x24d   : > { %2845 = vrcp.f32 %v3403_v8  ;;  %vm1286_vm9 = vmor %vm1284_vm7, %vm1285_vm5  ;;  %v1277_v9 = vsel %vm1274_vm8, %v1276_v3, %v1272_v32  ;;  %vm1299_vm12 = vweird.f32 %v3403_v8 }
 0x24e   : > { %v1281_v10 = vsub.f32 1.0, %v1280_v33  ;;  %v1305_v33 = vand.u32 2147483648, %v3403_v8 }
 0x250   : > { %v1282_v35 = vmul.f32 %v2842_v40, %v1281_v10 }
 0x251   : > { %v3406_v46 = vpop.f32.mrf.mxu3 }
 0x252   : > { %v2844_v49 = vpop.eup %2843  ;;  %v2673_v52 = vmul.f32 -1.442695, %v3406_v46  ;;  %v1283_v55 = vadd.f32 %v2842_v40, %v1282_v35 }
 0x253   : > { %v2846_v60 = vpop.eup %2845  ;;  %v1251_v2 = vadd.f32 1.0, %v2844_v49 }
 0x254   : > { %2847 = vpow2.f32 %v2673_v52  ;;  %v1287_v5 = vsel %vm1286_vm9, %v2842_v40, %v1283_v55  ;;  %v1295_v61 = vmul.f32 %v2846_v60, %v3403_v8  ;;  %vm1300_vm11 = vweird.f32 %v2846_v60 }
 0x255   : > { %2849 = vrcp.f32 %v1251_v2  ;;  %v1292_v12 = vsel %vm1289_vm10, %v1291_v4, %v1287_v5  ;;  %v1303_v40 = vand.u32 2147483647, %v3403_v8  ;;  %v1320_v16 = vand.u32 2147483648, %v1251_v2  ;;  %vm3434_vm14 = vmor %vm1299_vm12, %vm1300_vm11 }
 0x256   : > { %v1504_v24 = vpack.c.bf16 %v1292_v12, %v1277_v9  ;;  %v1296_v27 = vsub.f32 1.0, %v1295_v61  ;;  %v1318_v17 = vand.u32 2147483647, %v1251_v2  ;;  %vm1314_vm15 = vweird.f32 %v1251_v2 }
 0x257   : > { %vm1304_vm0 = vcmp.eq.f32.partialorder %v1303_v40, 8.507059e+37  ;;  %v1306_v8 = vor.u32 1.1754944e-38, %v1305_v33  ;;  %v1321_v55 = vor.u32 1.1754944e-38, %v1320_v16  ;;  %v1891_v40 = vadd.f32 %v3198_v28, %v3165_v18  ;;  %v2792_v16 = vld [vmem:[%s4627_s6 + $0x2c] sm:$0xf] }
 0x258   : > { %1528 = vrot.lane.b32.xlu1 %v1504_v24, %s3027_s14  ;;  %v1297_v26 = vmul.f32 %v2846_v60, %v1296_v27  ;;  %vm1319_vm2 = vcmp.eq.f32.partialorder %v1318_v17, 8.507059e+37 }
 0x259   : > { %v3423_v37 = vpop.f32.mrf.mxu3 }
 0x25a   : > { %v2848_v11 = vpop.eup %2847  ;;  %v2674_v21 = vmul.f32 -1.442695, %v3423_v37  ;;  %v1298_v50 = vadd.f32 %v2846_v60, %v1297_v26 }
 0x25b   : > { %v2850_v62 = vpop.eup %2849  ;;  %v3426_v1 = vadd.f32 1.0, %v2848_v11 }
 0x25c   : > { %2851 = vpow2.f32 %v2674_v21  ;;  %v1310_v54 = vmul.f32 %v2850_v62, %v1251_v2  ;;  %vm1315_vm13 = vweird.f32 %v2850_v62  ;;  %v1302_v47 = vsel %vm3434_vm14, %v2846_v60, %v1298_v50 }
 0x25d   : > { %2853 = vrcp.f32 %v3426_v1  ;;  %vm1316_vm1 = vmor %vm1314_vm15, %vm1315_vm13  ;;  %v1307_v5 = vsel %vm1304_vm0, %v1306_v8, %v1302_v47  ;;  %v1333_v26 = vand.u32 2147483647, %v3426_v1  ;;  %vm1329_vm4 = vweird.f32 %v3426_v1 }
 0x25e   : > { %v1311_v51 = vsub.f32 1.0, %v1310_v54 }
 0x25f   : > { %vm1334_vm8 = vcmp.eq.f32.partialorder %v1333_v26, 8.507059e+37 }
 0x260   : > { %v1312_v10 = vmul.f32 %v2850_v62, %v1311_v51 }
 0x261   : > { %v3432_v48 = vpop.f32.mrf.mxu3 }
 0x262   : > { %v2852_v35 = vpop.eup %2851  ;;  %v2675_v43 = vmul.f32 -1.442695, %v3432_v48  ;;  %v1313_v49 = vadd.f32 %v2850_v62, %v1312_v10 }
 0x263   : > { %v2854_v52 = vpop.eup %2853  ;;  %v1253_v32 = vadd.f32 1.0, %v2852_v35 }
 0x264   : > { %2855 = vpow2.f32 %v2675_v43  ;;  %v1317_v3 = vsel %vm1316_vm1, %v2850_v62, %v1313_v49  ;;  %v1325_v4 = vmul.f32 %v2854_v52, %v3426_v1  ;;  %vm1330_vm3 = vweird.f32 %v2854_v52 }
 0x265   : > { %2857 = vrcp.f32 %v1253_v32  ;;  %v1322_v61 = vsel %vm1319_vm2, %v1321_v55, %v1317_v3  ;;  %v1335_v62 = vand.u32 2147483648, %v3426_v1  ;;  %v1350_v54 = vand.u32 2147483648, %v1253_v32  ;;  %vm3456_vm6 = vmor %vm1329_vm4, %vm1330_vm3 }
 0x266   : > { %v1505_v9 = vpack.c.bf16 %v1322_v61, %v1307_v5  ;;  %v1326_v12 = vsub.f32 1.0, %v1325_v4  ;;  %v1348_v51 = vand.u32 2147483647, %v1253_v32  ;;  %vm1344_vm7 = vweird.f32 %v1253_v32 }
 0x267   : > { %v1336_v47 = vor.u32 1.1754944e-38, %v1335_v62  ;;  %v1351_v49 = vor.u32 1.1754944e-38, %v1350_v54  ;;  %v1978_v3 = vmax.f32 %v3165_v18, %v3198_v28  ;;  %v1892_v61 = vadd.f32 %v1891_v40, %v3128_v6  ;;  %v2794_v40 = vld [vmem:[%s4627_s6 + $0x34] sm:$0xf0] }
 0x268   : > { %1530 = vrot.lane.b32.xlu2 %v1505_v9, %s3027_s14  ;;  %v1327_v22 = vmul.f32 %v2854_v52, %v1326_v12  ;;  %vm1349_vm10 = vcmp.eq.f32.partialorder %v1348_v51, 8.507059e+37  ;;  %v1837_v9 = vadd.f32 %v3240_v42, %v3237_v41  ;;  %v1987_v62 = vmax.f32 %v3168_v19, %v3186_v25  ;;  %v2711_v51 = vld [vmem:[%s4627_s6 + $0x28] sm:$0xf] }
 0x269   : > { %v3443_v60 = vpop.f32.mrf.mxu3  ;;  %v1979_v12 = vmax.f32 %v1978_v3, %v3128_v6  ;;  %v1900_v6 = vadd.f32 %v3186_v25, %v3168_v19  ;;  %v1893_v26 = vadd.f32 %v1892_v61, %v3153_v14 }
 0x26a   : > { %v2856_v2 = vpop.eup %2855  ;;  %v2676_v13 = vmul.f32 -1.442695, %v3443_v60  ;;  %v1328_v11 = vadd.f32 %v2854_v52, %v1327_v22 }
 0x26b   : > { %v2858_v24 = vpop.eup %2857  ;;  %v3446_v27 = vadd.f32 1.0, %v2856_v2  ;;  %v1846_v2 = vadd.f32 %v3250_v45, %v3247_v44  ;;  %v1901_v3 = vadd.f32 %v1900_v6, %v3131_v7 }
 0x26c   : > { %2859 = vpow2.f32 %v2676_v13  ;;  %v1340_v31 = vmul.f32 %v2858_v24, %v1253_v32  ;;  %vm1345_vm5 = vweird.f32 %v2858_v24  ;;  %v1332_v34 = vsel %vm3456_vm6, %v2854_v52, %v1328_v11 }
 0x26d   : > { %2861 = vrcp.f32 %v3446_v27  ;;  %vm1346_vm9 = vmor %vm1344_vm7, %vm1345_vm5  ;;  %v1337_v52 = vsel %vm1334_vm8, %v1336_v47, %v1332_v34  ;;  %v1933_v11 = vmax.f32 %v3247_v44, %v3250_v45  ;;  %v1365_v34 = vand.u32 2147483648, %v3446_v27 }
 0x26e   : > { %v1341_v21 = vsub.f32 1.0, %v1340_v31  ;;  %v1924_v31 = vmax.f32 %v3237_v41, %v3240_v42  ;;  %v1838_v41 = vadd.f32 %v1837_v9, %v3273_v58  ;;  %v1847_v42 = vadd.f32 %v1846_v2, %v3276_v59 }
 0x26f   : > { %vm1359_vm12 = vweird.f32 %v3446_v27  ;;  %v1366_v2 = vor.u32 1.1754944e-38, %v1365_v34 }
 0x270   : > { %v1342_v50 = vmul.f32 %v2858_v24, %v1341_v21 }
 0x271   : > { %v3454_v33 = vpop.f32.mrf.mxu3 }
 0x272   : > { %v2860_v10 = vpop.eup %2859  ;;  %v2677_v17 = vmul.f32 -1.442695, %v3454_v33  ;;  %v1343_v35 = vadd.f32 %v2858_v24, %v1342_v50  ;;  %v1980_v50 = vmax.f32 %v1979_v12, %v3153_v14  ;;  %v2712_v14 = vor.u32 %v2794_v40, %v2711_v51 }
 0x273   : > { %v3463_v1 = vpop.eup %2861  ;;  %v3465_v43 = vadd.f32 1.0, %v2860_v10  ;;  %v2713_v10 = vld [vmem:[%s4627_s6 + $0x38] sm:$0xf0]  ;;  %v1902_v40 = vadd.f32 %v1901_v3, %v3156_v15 }
 0x274   : > { %2863 = vpow2.f32 %v2677_v17  ;;  %v1347_v8 = vsel %vm1346_vm9, %v2858_v24, %v1343_v35  ;;  %v1355_v55 = vmul.f32 %v3463_v1, %v3446_v27  ;;  %vm1360_vm11 = vweird.f32 %v3463_v1  ;;  %1713 = vmatpush.bf16.msrb.mxu0 %v2712_v14 }
 0x275   : > { %2865 = vrcp.f32 %v3465_v43  ;;  %v1352_v32 = vsel %vm1349_vm10, %v1351_v49, %v1347_v8  ;;  %v1363_v17 = vand.u32 2147483647, %v3446_v27  ;;  %v1380_v35 = vand.u32 2147483648, %v3465_v43  ;;  %vm3524_vm14 = vmor %vm1359_vm12, %vm1360_vm11 }
 0x276   : > { %v1506_v4 = vpack.c.bf16 %v1352_v32, %v1337_v52  ;;  %v1356_v5 = vsub.f32 1.0, %v1355_v55  ;;  %v2716_v47 = vor.u32 %v2792_v16, %v2713_v10  ;;  %v1378_v8 = vand.u32 2147483647, %v3465_v43 }
 0x277   : > { %v1894_v55 = vrot.slane %v1893_v26, 4  ;;  %v1988_v52 = vmax.f32 %v1987_v62, %v3131_v7  ;;  %vm1374_vm15 = vweird.f32 %v3465_v43  ;;  %vm1364_vm0 = vcmp.eq.f32.partialorder %v1363_v17, 8.507059e+37 }
 0x278   : > { %1532 = vrot.lane.b32.xlu0 %v1506_v4, %s3027_s14  ;;  %v1357_v22 = vmul.f32 %v3463_v1, %v1356_v5  ;;  %1762 = vmatpush.bf16.msrb.mxu1 %v2716_v47  ;;  %vm1379_vm2 = vcmp.eq.f32.partialorder %v1378_v8, 8.507059e+37  ;;  %v1981_v6 = vrot.slane %v1980_v50, 4  ;;  %v1925_v62 = vmax.f32 %v1924_v31, %v3273_v58 }
 0x279   : > { %v3479_v13 = vpop.f32.mrf.mxu3  ;;  %v3028_v14 = vmov 32.0   ;;  %v1934_v58 = vmax.f32 %v1933_v11, %v3276_v59  ;;  %v1848_v31 = vadd.f32 %v1847_v42, %v3290_v0 }
 0x27a   : > { %v2864_v18 = vpop.eup %2863  ;;  %v2678_v28 = vmul.f32 -1.442695, %v3479_v13  ;;  %v1358_v19 = vadd.f32 %v3463_v1, %v1357_v22  ;;  %v3548_v16 = vmax.f32 %v1980_v50, %v1981_v6  ;;  %v1903_v50 = vrot.slane %v1902_v40, 4 }
 0x27b   : > { %v2866_v24 = vpop.eup %2865  ;;  %v3489_v21 = vadd.f32 1.0, %v2864_v18  ;;  %v1381_v18 = vor.u32 1.1754944e-38, %v1380_v35  ;;  %v1849_v42 = vrot.slane %v1848_v31, 4 }
 0x27c   : > { %2867 = vpow2.f32 %v2678_v28  ;;  %v1370_v54 = vmul.f32 %v2866_v24, %v3465_v43  ;;  %vm1375_vm13 = vweird.f32 %v2866_v24  ;;  %v1362_v61 = vsel %vm3524_vm14, %v3463_v1, %v1358_v19 }
 0x27d   : > { %2869 = vrcp.f32 %v3489_v21  ;;  %vm1376_vm1 = vmor %vm1374_vm15, %vm1375_vm13  ;;  %v1367_v1 = vsel %vm1364_vm0, %v1366_v2, %v1362_v61  ;;  %v1989_v19 = vmax.f32 %v1988_v52, %v3156_v15  ;;  %v1983_v11 = vrot.slane %v3548_v16, 2 }
 0x27e   : > { %v1371_v25 = vsub.f32 1.0, %v1370_v54  ;;  %v3574_v52 = vadd.f32 %v1903_v50, %v1902_v40  ;;  %v1393_v4 = vand.u32 2147483647, %v3489_v21  ;;  %vm1389_vm4 = vweird.f32 %v3489_v21 }
 0x27f   : > { %v1990_v35 = vrot.slane %v1989_v19, 4 }
 0x280   : > { %v1372_v49 = vmul.f32 %v2866_v24, %v1371_v25  ;;  %v3544_v25 = vadd.f32 %v1894_v55, %v1893_v26  ;;  %v3558_v26 = vmax.f32 %v1925_v62, %v3286_v63  ;;  %vm1394_vm8 = vcmp.eq.f32.partialorder %v1393_v4, 8.507059e+37 }
 0x281   : > { %v3520_v32 = vpop.f32.mrf.mxu3 }
 0x282   : > { %v2868_v27 = vpop.eup %2867  ;;  %v2679_v5 = vmul.f32 -1.442695, %v3520_v32  ;;  %v1373_v9 = vadd.f32 %v2866_v24, %v1372_v49  ;;  %v1896_v44 = vrot.slane %v3544_v25, 2  ;;  %v1927_v8 = vrot.slane %v3558_v26, 4 }
 0x283   : > { %v3533_v7 = vpop.eup %2869  ;;  %v3535_v12 = vadd.f32 1.0, %v2868_v27  ;;  %v1395_v27 = vand.u32 2147483648, %v3489_v21 }
 0x284   : > { %2871 = vpow2.f32 %v2679_v5  ;;  %v1377_v28 = vsel %vm1376_vm1, %v2866_v24, %v1373_v9  ;;  %v1385_v22 = vmul.f32 %v3533_v7, %v3489_v21  ;;  %v1839_v24 = vadd.f32 %v1838_v41, %v3286_v63 }
 0x285   : > { %2873 = vrcp.f32 %v3535_v12  ;;  %v1382_v43 = vsel %vm1379_vm2, %v1381_v18, %v1377_v28  ;;  %v1935_v63 = vmax.f32 %v1934_v58, %v3290_v0  ;;  %vm1390_vm3 = vweird.f32 %v3533_v7 }
 0x286   : > { %v1507_v54 = vpack.c.bf16 %v1382_v43, %v1367_v1  ;;  %v1386_v51 = vsub.f32 1.0, %v1385_v22  ;;  %2875 = vrcp.f32 %v3028_v14  ;;  %v1840_v45 = vrot.slane %v1839_v24, 4  ;;  %vm3588_vm6 = vmor %vm1389_vm4, %vm1390_vm3 }
 0x287   : > { %v1410_v5 = vand.u32 2147483648, %v3535_v12  ;;  %v1408_v61 = vand.u32 2147483647, %v3535_v12  ;;  %v3581_v9 = vmax.f32 %v1989_v19, %v1990_v35  ;;  %v1850_v18 = vadd.f32 %v1849_v42, %v1848_v31 }
 0x288   : > { %1534 = vrot.lane.b32.xlu2 %v1507_v54, %s3027_s14  ;;  %v1387_v17 = vmul.f32 %v3533_v7, %v1386_v51  ;;  %v1936_v28 = vrot.slane %v1935_v63, 4  ;;  %vm1404_vm7 = vweird.f32 %v3535_v12  ;;  %v1396_v40 = vor.u32 1.1754944e-38, %v1395_v27 }
 0x289   : > { %v3555_v10 = vpop.f32.mrf.mxu3  ;;  %v1411_v19 = vor.u32 1.1754944e-38, %v1410_v5  ;;  %vm1409_vm10 = vcmp.eq.f32.partialorder %v1408_v61, 8.507059e+37  ;;  %v3604_v31 = vadd.f32 %v1840_v45, %v1839_v24  ;;  %v1882_v45 = vadd.f32 %v3231_v39, %v3204_v30  ;;  %v2974_v61 = vld [vmem:[%s3124_s23 + $0x90] sm:$0xff] }
 0x28a   : > { %v2872_v15 = vpop.eup %2871  ;;  %v2680_v41 = vmul.f32 -1.442695, %v3555_v10  ;;  %v1388_v55 = vadd.f32 %v3533_v7, %v1387_v17  ;;  %v1873_v17 = vadd.f32 %v3228_v38, %v3201_v29  ;;  %v3615_v35 = vmax.f32 %v1935_v63, %v1936_v28 }
 0x28b   : > { %v2874_v34 = vpop.eup %2873  ;;  %v3562_v47 = vadd.f32 1.0, %v2872_v15  ;;  %v2787_v15 = vld [vmem:[%s4627_s6 + $0x4] sm:$0xf]  ;;  %v3624_v29 = vmax.f32 %v3548_v16, %v1983_v11  ;;  %v3629_v30 = vmax.f32 %v3558_v26, %v1927_v8 }
 0x28c   : > { %2877 = vpow2.f32 %v2680_v41  ;;  %v1400_v59 = vmul.f32 %v2874_v34, %v3535_v12  ;;  %v3569_v49 = vpop.eup %2875  ;;  %vm1405_vm5 = vweird.f32 %v2874_v34  ;;  %v1392_v43 = vsel %vm3588_vm6, %v3533_v7, %v1388_v55  ;;  %v2689_v41 = vld [vmem:[%s4627_s6 + $0x10] sm:$0xf0]  ;;  %v2973_v8 = vld [vmem:[%s3124_s23 + $0x80] sm:$0xff] }
 0x28d   : > { %2879 = vrcp.f32 %v3562_v47  ;;  %v1910_v2 = vmul.f32 32.0, %v3569_v49  ;;  %vm1406_vm9 = vmor %vm1404_vm7, %vm1405_vm5  ;;  %v1397_v7 = vsel %vm1394_vm8, %v1396_v40, %v1392_v43  ;;  %v2692_v24 = vor.u32 %v2787_v15, %v2689_v41  ;;  %v2977_v41 = vld [vmem:[%s3124_s23 + $0x88] sm:$0xff] }
 0x28e   : > { %v1401_v3 = vsub.f32 1.0, %v1400_v59  ;;  %v3620_v59 = vadd.f32 %v1896_v44, %v3544_v25  ;;  %v1851_v55 = vrot.slane %v1850_v18, 2  ;;  %v1842_v44 = vrot.slane %v3604_v31, 2 }
 0x28f   : > { %v1911_v42 = vsub.f32 1.0, %v1910_v2  ;;  %1665 = vmatpush.bf16.msrb.mxu3 %v2692_v24  ;;  %v1938_v5 = vrot.slane %v3615_v35, 2  ;;  %v1960_v2 = vmax.f32 %v2973_v8, %v2974_v61  ;;  %v1423_v43 = vand.u32 2147483647, %v3562_v47  ;;  %v3674_v24 = vld [vmem:[%s3124_s23 + $0x50] sm:$0xff] }
 0x290   : > { %v1402_v0 = vmul.f32 %v2874_v34, %v1401_v3  ;;  %v2971_v3 = vld [vmem:[%s3124_s23 + $0xa0] sm:$0xff]  ;;  %vm1419_vm12 = vweird.f32 %v3562_v47  ;;  %vm1914_vm3 = vweird.f32 %v3569_v49 }
 0x291   : > { %v3584_v22 = vpop.f32.mrf.mxu3  ;;  %v1874_v4 = vadd.f32 %v2971_v3, %v1873_v17  ;;  %v3649_v6 = vmul.f32 %v3569_v49, %v1911_v42  ;;  %v1961_v15 = vmax.f32 %v1960_v2, %v2971_v3  ;;  %v2978_v17 = vld [vmem:[%s3124_s23 + $0x98] sm:$0xff]  ;;  %vm3696_vm15 = vcmp.eq.f32.partialorder %v1423_v43, 8.507059e+37  ;;  %v2703_v61 = vld [vmem:[%s4627_s6 + $0x20] sm:$0xf]  ;;  %v2793_v2 = vld [vmem:[%s4627_s6 + $0x2c] sm:$0xf0] }
 0x292   : > { %v2878_v1 = vpop.eup %2877  ;;  %v2681_v21 = vmul.f32 -1.442695, %v3584_v22  ;;  %v1403_v62 = vadd.f32 %v2874_v34, %v1402_v0  ;;  %v3641_v0 = vld [vmem:[%s3124_s23 + $0xa8] sm:$0xff] }
 0x293   : > { %v3597_v54 = vpop.eup %2879  ;;  %v3599_v51 = vadd.f32 1.0, %v2878_v1  ;;  %v1883_v26 = vadd.f32 %v3641_v0, %v1882_v45  ;;  %v3651_v1 = vadd.f32 %v1851_v55, %v1850_v18  ;;  %v1855_v45 = vadd.f32 %v3674_v24, %v3267_v56  ;;  %v3684_v55 = vld [vmem:[%s3124_s23 + $0x58] sm:$0xff]  ;;  %v2982_v56 = vld [vmem:[%s3124_s23 + $0x68] sm:$0xff] }
 0x294   : > { %2881 = vpow2.f32 %v2681_v21  ;;  %v1407_v14 = vsel %vm1406_vm9, %v2874_v34, %v1403_v62  ;;  %v1415_v58 = vmul.f32 %v3597_v54, %v3562_v47  ;;  %v1425_v62 = vand.u32 2147483648, %v3562_v47 }
 0x295   : > { %2883 = vrcp.f32 %v3599_v51  ;;  %v1412_v12 = vsel %vm1409_vm10, %v1411_v19, %v1407_v14  ;;  %v1438_v40 = vand.u32 2147483647, %v3599_v51  ;;  %v2975_v19 = vld [vmem:[%s3124_s23 + $0xb0] sm:$0xff]  ;;  %vm1420_vm11 = vweird.f32 %v3597_v54 }
 0x296   : > { %v1508_v34 = vpack.c.bf16 %v1412_v12, %v1397_v7  ;;  %v1416_v50 = vsub.f32 1.0, %v1415_v58  ;;  %v3660_v14 = vadd.f32 %v2975_v19, %v1874_v4  ;;  %v3665_v7 = vld [vmem:[%s3124_s23 + $0xb8] sm:$0xff]  ;;  %vm3692_vm14 = vmor %vm1419_vm12, %vm1420_vm11  ;;  %v1426_v47 = vor.u32 1.1754944e-38, %v1425_v62  ;;  %v2984_v4 = vld [vmem:[%s3124_s23 + $0x40] sm:$0xff] }
 0x297   : > { %v3668_v12 = vadd.f32 %v3665_v7, %v1883_v26  ;;  %vm3700_vm0 = vcmp.eq.f32.partialorder %v1438_v40, 8.507059e+37  ;;  %vm1434_vm1 = vweird.f32 %v3599_v51  ;;  %v3718_v43 = vmax.f32 %v1961_v15, %v2975_v19  ;;  %v2981_v19 = vld [vmem:[%s3124_s23 + $0x60] sm:$0xff] }
 0x298   : > { %1536 = vrot.lane.b32.xlu1 %v1508_v34, %s3027_s14  ;;  %v1417_v16 = vmul.f32 %v3597_v54, %v1416_v50  ;;  %v1969_v34 = vmax.f32 %v2977_v41, %v2978_v17  ;;  %v1440_v50 = vand.u32 2147483648, %v3599_v51  ;;  %v2704_v40 = vor.u32 %v2793_v2, %v2703_v61  ;;  %v2983_v61 = vld [vmem:[%s3124_s23 + $0x48] sm:$0xff] }
 0x299   : > { %v3631_v39 = vpop.f32.mrf.mxu3  ;;  %v1856_v15 = vadd.f32 %v2981_v19, %v1855_v45  ;;  %v2687_v45 = vld [vmem:[%s4627_s6] sm:$0xf]  ;;  %v1951_v2 = vmax.f32 %v2983_v61, %v3684_v55  ;;  %v1876_v38 = vrot.slane %v3660_v14, 4 }
 0x29a   : > { %v2882_v25 = vpop.eup %2881  ;;  %v2682_v27 = vmul.f32 -1.442695, %v3631_v39  ;;  %v1418_v18 = vadd.f32 %v3597_v54, %v1417_v16  ;;  %1615 = vmatpush.bf16.msrb.mxu2 %v2704_v40  ;;  %v1929_v40 = vrot.slane %v3629_v30, 2 }
 0x29b   : > { %v3637_v11 = vpop.eup %2883  ;;  %v3646_v28 = vadd.f32 1.0, %v2882_v25  ;;  %v1864_v25 = vadd.f32 %v3684_v55, %v3270_v57  ;;  %v1885_v55 = vrot.slane %v3668_v12, 4 }
 0x29c   : > { %2885 = vpow2.f32 %v2682_v27  ;;  %v1430_v21 = vmul.f32 %v3637_v11, %v3599_v51  ;;  %vm1435_vm13 = vweird.f32 %v3637_v11  ;;  %v1422_v26 = vsel %vm3692_vm14, %v3597_v54, %v1418_v18  ;;  %v2695_v18 = vld [vmem:[%s4627_s6 + $0x8] sm:$0xf] }
 0x29d   : > { %2887 = vrcp.f32 %v3646_v28  ;;  %vm3724_vm2 = vmor %vm1434_vm1, %vm1435_vm13  ;;  %v1441_v51 = vor.u32 1.1754944e-38, %v1440_v50  ;;  %v2788_v50 = vld [vmem:[%s4627_s6 + $0xc] sm:$0xf]  ;;  %vm1449_vm5 = vweird.f32 %v3646_v28 }
 0x29e   : > { %v1431_v58 = vsub.f32 1.0, %v1430_v21 }
 0x2a0   : > { %832 = vrot.lane.b32.xlu1 %v3391_v20, %s3029_s30  ;;  %v1432_v42 = vmul.f32 %v3637_v11, %v1431_v58  ;;  %v2790_v58 = vld [vmem:[%s4627_s6 + $0x14] sm:$0xf0] }
 0x2a1   : > { %v3688_v3 = vpop.f32.mrf.mxu3 }
 0x2a2   : > { %v2886_v16 = vpop.eup %2885  ;;  %v2683_v57 = vmul.f32 -1.442695, %v3688_v3  ;;  %v1433_v8 = vadd.f32 %v3637_v11, %v1432_v42  ;;  %v2697_v42 = vld [vmem:[%s4627_s6 + $0x18] sm:$0xf0] }
 0x2a3   : > { %v3716_v21 = vpop.eup %2887  ;;  %v3720_v62 = vadd.f32 1.0, %v2886_v16  ;;  %v1865_v16 = vadd.f32 %v2982_v56, %v1864_v25  ;;  %v2696_v25 = vor.u32 %v2790_v58, %v2695_v18  ;;  %v2700_v27 = vor.u32 %v2788_v50, %v2697_v42  ;;  %v2986_v58 = vld [vmem:[%s3124_s23 + $0x78] sm:$0xff] }
 0x2a4   : > { %2889 = vpow2.f32 %v2683_v57  ;;  %v1437_v41 = vsel %vm3724_vm2, %v3637_v11, %v1433_v8  ;;  %v1445_v17 = vmul.f32 %v3716_v21, %v3646_v28  ;;  %v1427_v11 = vsel %vm3696_vm15, %v1426_v47, %v1422_v26  ;;  %v2789_v8 = vld [vmem:[%s4627_s6 + $0xc] sm:$0xf0] }
 0x2a5   : > { %2891 = vrcp.f32 %v3720_v62  ;;  %v1442_v57 = vsel %vm3700_vm0, %v1441_v51, %v1437_v41  ;;  %v1942_v47 = vmax.f32 %v2984_v4, %v3674_v24  ;;  %v2688_v26 = vor.u32 %v2789_v8, %v2687_v45  ;;  %1714 = vmatpush.bf16.msrb.mxu0 %v2696_v25  ;;  %1763 = vmatpush.bf16.msrb.mxu1 %v2700_v27 }
 0x2a6   : > { %v1509_v54 = vpack.c.bf16 %v1442_v57, %v1427_v11  ;;  %v1446_v63 = vsub.f32 1.0, %v1445_v17  ;;  %v3766_v51 = vadd.f32 %v1842_v44, %v3604_v31  ;;  %v1970_v41 = vmax.f32 %v1969_v34, %v3641_v0  ;;  %v2985_v31 = vld [vmem:[%s3124_s23 + $0x70] sm:$0xff] }
 0x2a7   : > { %v3777_v24 = vmax.f32 %v3615_v35, %v1938_v5  ;;  %v1963_v18 = vrot.slane %v3718_v43, 4  ;;  %v1857_v44 = vadd.f32 %v2985_v31, %v1856_v15  ;;  %v1866_v17 = vadd.f32 %v2986_v58, %v1865_v16  ;;  %1616 = vmatpush.bf16.msrb.mxu2 %v2688_v26 }
 0x2a8   : > { %838 = vrot.lane.b32.xlu1 %v3400_v53, %s3029_s30  ;;  %1538 = vrot.lane.b32.xlu0 %v1509_v54, %s3027_s14  ;;  %v3786_v34 = vadd.f32 %v3569_v49, %v3649_v6  ;;  %v1952_v42 = vmax.f32 %v1951_v2, %v2982_v56  ;;  %v1447_v35 = vmul.f32 %v3716_v21, %v1446_v63  ;;  %v1853_v15 = vrot.slane %v3651_v1, 1 }
 0x2a9   : > { %v3782_v50 = vpop.f32.mrf.mxu3  ;;  %v3792_v16 = vadd.f32 %v1876_v38, %v3660_v14  ;;  %v1943_v11 = vmax.f32 %v1942_v47, %v2981_v19  ;;  %v1886_v8 = vadd.f32 %v1885_v55, %v3668_v12  ;;  %v1971_v6 = vmax.f32 %v1970_v41, %v3665_v7 }
 0x2aa   : > { %v2890_v0 = vpop.eup %2889  ;;  %v2684_v45 = vmul.f32 -1.442695, %v3782_v50  ;;  %v3801_v63 = vmax.f32 %v3718_v43, %v1963_v18  ;;  %v1858_v61 = vrot.slane %v1857_v44, 4  ;;  %v1867_v2 = vrot.slane %v1866_v17, 4 }
 0x2ab   : > { %v2892_v5 = vpop.eup %2891  ;;  %v3794_v57 = vadd.f32 1.0, %v2890_v0  ;;  %v1953_v38 = vmax.f32 %v1952_v42, %v2986_v58  ;;  %v1448_v14 = vadd.f32 %v3716_v21, %v1447_v35  ;;  %vm1450_vm4 = vweird.f32 %v3716_v21 }
 0x2ac   : > { %2893 = vpow2.f32 %v2684_v45  ;;  %v1460_v56 = vmul.f32 %v2892_v5, %v3720_v62  ;;  %v1944_v19 = vmax.f32 %v1943_v11, %v2985_v31  ;;  %v1455_v7 = vand.u32 2147483648, %v3646_v28  ;;  %vm3817_vm7 = vmor %vm1449_vm5, %vm1450_vm4 }
 0x2ad   : > { %2895 = vrcp.f32 %v3794_v57  ;;  %v1470_v54 = vand.u32 2147483648, %v3720_v62  ;;  %v1453_v43 = vand.u32 2147483647, %v3646_v28  ;;  %vm1465_vm6 = vweird.f32 %v2892_v5 }
 0x2ae   : > { %v1461_v12 = vsub.f32 1.0, %v1460_v56  ;;  %v1468_v4 = vand.u32 2147483647, %v3720_v62  ;;  %v1887_v47 = vrot.slane %v1886_v8, 2  ;;  %v1972_v27 = vrot.slane %v1971_v6, 4 }
 0x2af   : > { %v1859_v26 = vadd.f32 %v1858_v61, %v1857_v44  ;;  %v1868_v55 = vadd.f32 %v1867_v2, %v1866_v17  ;;  %v1954_v31 = vrot.slane %v1953_v38, 4  ;;  %v1452_v28 = vsel %vm3817_vm7, %v3716_v21, %v1448_v14 }
 0x2b0   : > { %842 = vrot.lane.b32.xlu1 %v3423_v37, %s3029_s30  ;;  %834 = vrot.lane.b32.xlu0 %v3394_v23, %s3029_s30  ;;  %v1462_v25 = vmul.f32 %v2892_v5, %v1461_v12  ;;  %vm1464_vm8 = vweird.f32 %v3720_v62  ;;  %v1945_v42 = vrot.slane %v1944_v19, 4  ;;  %v1456_v17 = vor.u32 1.1754944e-38, %v1455_v7 }
 0x2b1   : > { %vm1466_vm9 = vmor %vm1464_vm8, %vm1465_vm6  ;;  %v1471_v45 = vor.u32 1.1754944e-38, %v1470_v54  ;;  %vm1454_vm10 = vcmp.eq.f32.partialorder %v1453_v43, 8.507059e+37  ;;  %vm1469_vm11 = vcmp.eq.f32.partialorder %v1468_v4, 8.507059e+37  ;;  %v1869_v56 = vrot.slane %v1868_v55, 2 }
 0x2b2   : > { %v2894_v18 = vpop.eup %2893  ;;  %v1463_v58 = vadd.f32 %v2892_v5, %v1462_v25  ;;  %v1457_v21 = vsel %vm1454_vm10, %v1456_v17, %v1452_v28  ;;  %v4650_v61 = vrot.slane %v3574_v52, 2  ;;  %v1955_v14 = vmax.f32 %v1953_v38, %v1954_v31 }
 0x2b3   : > { %v3825_v0 = vpop.eup %2895  ;;  %v3827_v44 = vadd.f32 1.0, %v2894_v18  ;;  %v1844_v54 = vrot.slane %v3766_v51, 1  ;;  %v1940_v43 = vrot.slane %v3777_v24, 1  ;;  %v1973_v25 = vmax.f32 %v1971_v6, %v1972_v27 }
 0x2b4   : > { %v1467_v35 = vsel %vm1466_vm9, %v2892_v5, %v1463_v58  ;;  %v1475_v11 = vmul.f32 %v3825_v0, %v3794_v57  ;;  %v3836_v2 = vadd.f32 %v4650_v61, %v3574_v52  ;;  %v3842_v5 = vmax.f32 %v3629_v30, %v1929_v40 }
 0x2b5   : > { %2897 = vrcp.f32 %v3827_v44  ;;  %v1472_v62 = vsel %vm1469_vm11, %v1471_v45, %v1467_v35  ;;  %v3849_v4 = vsel %vm1914_vm3, %v3569_v49, %v3786_v34  ;;  %v1854_v52 = vadd.f32 %v1853_v15, %v3651_v1 }
 0x2b6   : > { %v1510_v12 = vpack.c.bf16 %v1472_v62, %v1457_v21  ;;  %v1476_v7 = vsub.f32 1.0, %v1475_v11  ;;  %v1878_v38 = vrot.slane %v3792_v16, 2  ;;  %v1965_v41 = vrot.slane %v3801_v63, 2 }
 0x2b7   : > { %v1888_v30 = vadd.f32 %v1887_v47, %v1886_v8  ;;  %v1860_v40 = vrot.slane %v1859_v26, 2  ;;  %v1870_v6 = vadd.f32 %v1869_v56, %v1868_v55  ;;  %v1946_v27 = vmax.f32 %v1944_v19, %v1945_v42 }
 0x2b8   : > { %848 = vrot.lane.b32.xlu1 %v3454_v33, %s3029_s30  ;;  %1540 = vrot.lane.b32.xlu2 %v1510_v12, %s3027_s14  ;;  %v1907_v18 = vrot.slane %v3836_v2, 1  ;;  %v4651_v49 = vrot.slane %v3581_v9, 2  ;;  %v1956_v1 = vrot.slane %v1955_v14, 2  ;;  %v1477_v15 = vmul.f32 %v3825_v0, %v1476_v7 }
 0x2b9   : > { %v1845_v28 = vadd.f32 %v1844_v54, %v3766_v51  ;;  %v1931_v58 = vrot.slane %v3842_v5, 1  ;;  %v1941_v8 = vmax.f32 %v3777_v24, %v1940_v43  ;;  %v1974_v47 = vrot.slane %v1973_v25, 2 }
 0x2ba   : > { %v3861_v34 = vmax.f32 %v3581_v9, %v4651_v49  ;;  %v1917_v19 = vmul.f32 %v3849_v4, %v1854_v52  ;;  %v1879_v55 = vadd.f32 %v1878_v38, %v3792_v16  ;;  %v1966_v42 = vmax.f32 %v3801_v63, %v1965_v41 }
 0x2bb   : > { %v2898_v31 = vpop.eup %2897  ;;  %v1889_v17 = vrot.slane %v1888_v30, 1  ;;  %v1861_v45 = vadd.f32 %v1860_v40, %v1859_v26  ;;  %v1871_v35 = vrot.slane %v1870_v6, 1  ;;  %v1947_v11 = vrot.slane %v1946_v27, 2 }
 0x2bc   : > { %v1490_v9 = vmul.f32 %v2898_v31, %v3827_v44  ;;  %v1957_v56 = vmax.f32 %v1955_v14, %v1956_v1  ;;  %v1478_v51 = vadd.f32 %v3825_v0, %v1477_v15  ;;  %vm1480_vm12 = vweird.f32 %v3825_v0 }
 0x2bd   : > { %v1975_v24 = vmax.f32 %v1973_v25, %v1974_v47  ;;  %vm1479_vm13 = vweird.f32 %v3794_v57  ;;  %v1485_v62 = vand.u32 2147483648, %v3794_v57  ;;  %v1500_v16 = vand.u32 2147483648, %v3827_v44 }
 0x2be   : > { %v1491_v21 = vsub.f32 1.0, %v1490_v9  ;;  %v1483_v63 = vand.u32 2147483647, %v3794_v57  ;;  %vm1495_vm14 = vweird.f32 %v2898_v31  ;;  %v1498_v61 = vand.u32 2147483647, %v3827_v44  ;;  %vm3884_vm15 = vmor %vm1479_vm13, %vm1480_vm12 }
 0x2bf   : > { %v1880_v14 = vrot.slane %v1879_v55, 1  ;;  %v1862_v12 = vrot.slane %v1861_v45, 1  ;;  %v1872_v7 = vadd.f32 %v1871_v35, %v1870_v6  ;;  %v1948_v54 = vmax.f32 %v1946_v27, %v1947_v11 }
 0x2c0   : > { %854 = vrot.lane.b32.xlu1 %v3555_v10, %s3029_s30  ;;  %836 = vrot.lane.b32.xlu2 %v3397_v36, %s3029_s30  ;;  %v1492_v26 = vmul.f32 %v2898_v31, %v1491_v21  ;;  %v1958_v25 = vrot.slane %v1957_v56, 1  ;;  %v1482_v52 = vsel %vm3884_vm15, %v3825_v0, %v1478_v51  ;;  %vm1494_vm0 = vweird.f32 %v3827_v44 }
 0x2c1   : > { %v1967_v38 = vrot.slane %v1966_v42, 1  ;;  %v1976_v41 = vrot.slane %v1975_v24, 1  ;;  %v1486_v40 = vor.u32 1.1754944e-38, %v1485_v62  ;;  %vm1496_vm1 = vmor %vm1494_vm0, %vm1495_vm14  ;;  %v1501_v6 = vor.u32 1.1754944e-38, %v1500_v16 }
 0x2c2   : > { %v1493_v57 = vadd.f32 %v2898_v31, %v1492_v26  ;;  %v1890_v27 = vadd.f32 %v1889_v17, %v1888_v30  ;;  %vm1484_vm2 = vcmp.eq.f32.partialorder %v1483_v63, 8.507059e+37  ;;  %vm1499_vm3 = vcmp.eq.f32.partialorder %v1498_v61, 8.507059e+37 }
 0x2c3   : > { %v1863_v1 = vadd.f32 %v1862_v12, %v1861_v45  ;;  %v1949_v15 = vrot.slane %v1948_v54, 1  ;;  %v1487_v47 = vsel %vm1484_vm2, %v1486_v40, %v1482_v52  ;;  %v1898_v35 = vrot.slane %v3620_v59, 1  ;;  %v1531_v52 = vpop.permute.xlu2 %1530 }
 0x2c4   : > { %v1497_v49 = vsel %vm1496_vm1, %v2898_v31, %v1493_v57  ;;  %v1919_v0 = vmul.f32 %v3849_v4, %v1872_v7  ;;  %v1959_v11 = vmax.f32 %v1957_v56, %v1958_v25  ;;  %v1916_v44 = vmul.f32 %v3849_v4, %v1845_v28 }
 0x2c5   : > { %v1502_v9 = vsel %vm1499_vm3, %v1501_v6, %v1497_v49  ;;  %v1932_v21 = vmax.f32 %v3842_v5, %v1931_v58  ;;  %v1881_v62 = vadd.f32 %v1880_v14, %v1879_v55  ;;  %v1977_v16 = vmax.f32 %v1975_v24, %v1976_v41 }
 0x2c6   : > { %v1511_v51 = vpack.c.bf16 %v1502_v9, %v1487_v47  ;;  %v3896_v30 = vadd.f32 %v1941_v8, %v1917_v19  ;;  %vm1584_vm4 = vcmask 261120   ;;  %v1908_v31 = vadd.f32 %v1907_v18, %v3836_v2 }
 0x2c7   : > { %v1994_v17 = vrot.slane %v3861_v34, 1  ;;  %v1968_v28 = vmax.f32 %v1966_v42, %v1967_v38  ;;  %v1918_v5 = vmul.f32 %v3849_v4, %v1863_v1  ;;  %v1950_v58 = vmax.f32 %v1948_v54, %v1949_v15 }
 0x2c8   : > { %840 = vrot.lane.b32.xlu2 %v3406_v46, %s3029_s30  ;;  %860 = vrot.lane.b32.xlu1 %v3688_v3, %s3029_s30  ;;  %v1921_v8 = vmul.f32 %v3849_v4, %v1890_v27  ;;  %v1923_v55 = vmul.f32 %v3849_v4, %v1908_v31  ;;  %v3911_v56 = vadd.f32 %v1959_v11, %v1919_v0  ;;  %vm2012_vm5 = vcmask 1041409  }
 0x2c9   : > { %1542 = vrot.lane.b32.xlu0 %v1511_v51, %s3027_s14  ;;  %v1995_v45 = vmax.f32 %v3861_v34, %v1994_v17  ;;  %v1899_v24 = vadd.f32 %v1898_v35, %v3620_v59  ;;  %v1920_v18 = vmul.f32 %v3849_v4, %v1881_v62  ;;  %v1985_v42 = vrot.slane %v3624_v29, 1 }
 0x2ca   : > { %v1529_v19 = vpop.permute.xlu1 %1528  ;;  %v3916_v2 = vadd.f32 %v1977_v16, %v1921_v8  ;;  %vm2014_vm6 = vcmask 1042434   ;;  %vm2016_vm7 = vcmask 1043459   ;;  %v2018_v59 = vsel %vm2012_vm5, %v3911_v56, %v3896_v30 }
 0x2cb   : > { %2717 = vmatmul.msk.bf16.vlgmr.msrb.gmra.mxu2 %vm1584_vm4, %v1529_v19  ;;  %2725 = vmatmul.msk.bf16.vlgmr.msrb.gmra.mxu3 %vm1584_vm4, %v1529_v19  ;;  %v3922_v34 = vadd.f32 %v1995_v45, %v1923_v55  ;;  %v3927_v63 = vadd.f32 %v1932_v21, %v1916_v44  ;;  %v3931_v61 = vadd.f32 %v1950_v58, %v1918_v5  ;;  %v3037_v49 = vmov 0  }
 0x2cc   : > { %2733 = vmatmul.msk.bf16.vlgmr.msrb.gmra.mxu0 %vm1584_vm4, %v1529_v19  ;;  %2741 = vmatmul.msk.bf16.vlgmr.msrb.gmra.mxu1 %vm1584_vm4, %v1529_v19  ;;  %v2019_v26 = vsel %vm2014_vm6, %v3916_v2, %v2018_v59  ;;  %v1922_v12 = vmul.f32 %v3849_v4, %v1899_v24  ;;  %v1986_v7 = vmax.f32 %v3624_v29, %v1985_v42 }
 0x2cd   : > { %v2020_v14 = vsel %vm2016_vm7, %v3922_v34, %v2019_v26  ;;  %v3939_v54 = vadd.f32 %v1968_v28, %v1920_v18  ;;  %v2013_v43 = vsel %vm2012_vm5, %v3931_v61, %v3927_v63  ;;  %2830 = vset.pattern.permute.xlu1 %v3037_v49  ;;  %2832 = vset.pattern.permute.xlu2 %v3037_v49 }
 0x2ce   : > { %v3946_v25 = vadd.f32 %v1986_v7, %v1922_v12  ;;  %2831 = vset.pattern.permute.xlu0 %v3037_v49 }
 0x2cf   : > { %v2015_v4 = vsel %vm2014_vm6, %v3939_v54, %v2013_v43 }
 0x2d0   : > { %846 = vrot.lane.b32.xlu2 %v3443_v60, %s3029_s30  ;;  %2025 = vrot.lane.b32.xlu1 %v2020_v14, %s3030_s9  ;;  %v2017_v29 = vsel %vm2016_vm7, %v3946_v25, %v2015_v4 }
 0x2d1   : > { %844 = vrot.lane.b32.xlu0 %v3432_v48, %s3029_s30 }
 0x2d8   : > { %852 = vrot.lane.b32.xlu2 %v3520_v32, %s3029_s30  ;;  %2060 = vrot.lane.b32.xlu1 %v2017_v29, %s3031_s10 }
 0x2d9   : > { %850 = vrot.lane.b32.xlu0 %v3479_v13, %s3029_s30 }
 0x2db   : > { %2718 = vmatmul.msk.bf16.gmra.mxu2 %vm1584_vm4, %v1531_v52  ;;  %2726 = vmatmul.msk.bf16.gmra.mxu3 %vm1584_vm4, %v1531_v52 }
 0x2dc   : > { %2734 = vmatmul.msk.bf16.gmra.mxu0 %vm1584_vm4, %v1531_v52  ;;  %2742 = vmatmul.msk.bf16.gmra.mxu1 %vm1584_vm4, %v1531_v52 }
 0x2e0   : > { %858 = vrot.lane.b32.xlu2 %v3631_v39, %s3029_s30  ;;  %2080 = vrot.lane.b32.xlu1 %v2020_v14, %s3032_s12 }
 0x2e1   : > { %856 = vrot.lane.b32.xlu0 %v3584_v22, %s3029_s30 }
 0x2e2   : > { %v1535_v38 = vpop.permute.xlu2 %1534 }
 0x2e8   : > { %2023 = vrot.lane.b32.xlu2 %v2017_v29, %s3030_s9  ;;  %2153 = vrot.lane.b32.xlu1 %v2017_v29, %s3033_s13 }
 0x2e9   : > { %862 = vrot.lane.b32.xlu0 %v3782_v50, %s3029_s30  ;;  %s3036_s30 = smov 111  }
 0x2ea   : > { %v1533_v57 = vpop.permute.xlu0 %1532 }
 0x2eb   : > { %2719 = vmatmul.msk.bf16.gmra.mxu2 %vm1584_vm4, %v1533_v57  ;;  %2727 = vmatmul.msk.bf16.gmra.mxu3 %vm1584_vm4, %v1533_v57 }
 0x2ec   : > { %2735 = vmatmul.msk.bf16.gmra.mxu0 %vm1584_vm4, %v1533_v57  ;;  %2743 = vmatmul.msk.bf16.gmra.mxu1 %vm1584_vm4, %v1533_v57 }
 0x2f0   : > { %2044 = vrot.lane.b32.xlu2 %v2020_v14, %s3034_s15  ;;  %2173 = vrot.lane.b32.xlu1 %v2020_v14, %s3035_s17 }
 0x2f1   : > { %2042 = vrot.lane.b32.xlu0 %v2017_v29, %s3034_s15 }
 0x2f8   : > { %2078 = vrot.lane.b32.xlu2 %v2017_v29, %s3032_s12 }
 0x2f9   : > { %2062 = vrot.lane.b32.xlu0 %v2020_v14, %s3031_s10 }
 0x2fb   : > { %2720 = vmatmul.msk.bf16.gmra.mxu2 %vm1584_vm4, %v1535_v38  ;;  %2728 = vmatmul.msk.bf16.gmra.mxu3 %vm1584_vm4, %v1535_v38 }
 0x2fc   : > { %2736 = vmatmul.msk.bf16.gmra.mxu0 %vm1584_vm4, %v1535_v38  ;;  %2744 = vmatmul.msk.bf16.gmra.mxu1 %vm1584_vm4, %v1535_v38 }
 0x300   : > { %2137 = vrot.lane.b32.xlu2 %v2020_v14, %s3027_s14 }
 0x301   : > { %2135 = vrot.lane.b32.xlu0 %v2017_v29, %s3027_s14 }
 0x308   : > { %2171 = vrot.lane.b32.xlu2 %v2017_v29, %s3035_s17 }
 0x309   : > { %2155 = vrot.lane.b32.xlu0 %v2020_v14, %s3033_s13 }
 0x30a   : > { %v1537_v41 = vpop.permute.xlu1 %1536 }
 0x30b   : > { %2721 = vmatmul.msk.bf16.gmra.mxu2 %vm1584_vm4, %v1537_v41  ;;  %2729 = vmatmul.msk.bf16.gmra.mxu3 %vm1584_vm4, %v1537_v41 }
 0x30c   : > { %2737 = vmatmul.msk.bf16.gmra.mxu0 %vm1584_vm4, %v1537_v41  ;;  %2745 = vmatmul.msk.bf16.gmra.mxu1 %vm1584_vm4, %v1537_v41 }
 0x310   : > { %2191 = vrot.lane.b32.xlu2 %v2020_v14, %s3036_s30 }
 0x311   : > { %2189 = vrot.lane.b32.xlu0 %v2017_v29, %s3036_s30 }
 0x312   : > { %v833_v40 = vpop.permute.xlu1 %832  ;;  %v1541_v6 = vpop.permute.xlu2 %1540 }
 0x313   : > { %v880_v27 = vadd.f32 %v833_v40, %v3391_v20 }
 0x315   : > { %v2653_v1 = vmul.f32 -1.442695, %v880_v27 }
 0x317   : > { %2899 = vpow2.f32 %v2653_v1 }
 0x31a   : > { %v839_v15 = vpop.permute.xlu1 %838  ;;  %v1539_v47 = vpop.permute.xlu0 %1538 }
 0x31b   : > { %v883_v9 = vadd.f32 %v839_v15, %v3400_v53  ;;  %v837_v35 = vpop.permute.xlu2 %836  ;;  %2722 = vmatmul.msk.bf16.gmra.mxu2 %vm1584_vm4, %v1539_v47  ;;  %2730 = vmatmul.msk.bf16.gmra.mxu3 %vm1584_vm4, %v1539_v47 }
 0x31c   : > { %v882_v0 = vadd.f32 %v837_v35, %v3397_v36  ;;  %2738 = vmatmul.msk.bf16.gmra.mxu0 %vm1584_vm4, %v1539_v47  ;;  %2746 = vmatmul.msk.bf16.gmra.mxu1 %vm1584_vm4, %v1539_v47 }
 0x31d   : > { %v2900_v20 = vpop.eup %2899  ;;  %v2656_v11 = vmul.f32 -1.442695, %v883_v9 }
 0x31e   : > { %v944_v51 = vadd.f32 1.0, %v2900_v20  ;;  %v2655_v44 = vmul.f32 -1.442695, %v882_v0 }
 0x31f   : > { %2901 = vpow2.f32 %v2656_v11 }
 0x320   : > { %2903 = vrcp.f32 %v944_v51  ;;  %v971_v18 = vand.u32 2147483648, %v944_v51  ;;  %vm965_vm8 = vweird.f32 %v944_v51 }
 0x321   : > { %2905 = vpow2.f32 %v2655_v44 }
 0x322   : > { %v843_v21 = vpop.permute.xlu1 %842  ;;  %v835_v53 = vpop.permute.xlu0 %834  ;;  %v972_v7 = vor.u32 1.1754944e-38, %v971_v18 }
 0x323   : > { %v885_v62 = vadd.f32 %v843_v21, %v3423_v37  ;;  %v881_v16 = vadd.f32 %v835_v53, %v3394_v23  ;;  %v841_v31 = vpop.permute.xlu2 %840  ;;  %v969_v37 = vand.u32 2147483647, %v944_v51 }
 0x324   : > { %v884_v36 = vadd.f32 %v841_v31, %v3406_v46 }
 0x325   : > { %v2902_v17 = vpop.eup %2901  ;;  %v2658_v28 = vmul.f32 -1.442695, %v885_v62  ;;  %v2654_v5 = vmul.f32 -1.442695, %v881_v16  ;;  %vm4002_vm10 = vcmp.eq.f32.partialorder %v969_v37, 8.507059e+37 }
 0x326   : > { %v2904_v58 = vpop.eup %2903  ;;  %v3990_v8 = vadd.f32 1.0, %v2902_v17  ;;  %v2657_v55 = vmul.f32 -1.442695, %v884_v36 }
 0x327   : > { %v2906_v19 = vpop.eup %2905  ;;  %2907 = vpow2.f32 %v2658_v28  ;;  %v961_v45 = vmul.f32 %v2904_v58, %v944_v51  ;;  %vm966_vm9 = vweird.f32 %v2904_v58 }
 0x328   : > { %2909 = vrcp.f32 %v3990_v8  ;;  %v3993_v24 = vadd.f32 1.0, %v2906_v19  ;;  %vm1010_vm11 = vweird.f32 %v3990_v8  ;;  %vm967_vm12 = vmor %vm965_vm8, %vm966_vm9  ;;  %v1016_v40 = vand.u32 2147483648, %v3990_v8 }
 0x329   : > { %2911 = vpow2.f32 %v2654_v5  ;;  %v962_v23 = vsub.f32 1.0, %v961_v45 }
 0x32a   : > { %2913 = vrcp.f32 %v3993_v24  ;;  %v849_v46 = vpop.permute.xlu1 %848  ;;  %v999_v52 = vand.u32 2147483647, %v3993_v24  ;;  %v1001_v41 = vand.u32 2147483648, %v3993_v24  ;;  %vm995_vm13 = vweird.f32 %v3993_v24 }
 0x32b   : > { %2915 = vpow2.f32 %v2657_v55  ;;  %v888_v42 = vadd.f32 %v849_v46, %v3454_v33  ;;  %v847_v59 = vpop.permute.xlu2 %846  ;;  %2723 = vmatmul.msk.bf16.gmra.mxu2 %vm1584_vm4, %v1541_v6  ;;  %2731 = vmatmul.msk.bf16.gmra.mxu3 %vm1584_vm4, %v1541_v6  ;;  %v963_v26 = vmul.f32 %v2904_v58, %v962_v23  ;;  %v1014_v33 = vand.u32 2147483647, %v3990_v8 }
 0x32c   : > { %v887_v14 = vadd.f32 %v847_v59, %v3443_v60  ;;  %2739 = vmatmul.msk.bf16.gmra.mxu0 %vm1584_vm4, %v1541_v6  ;;  %2747 = vmatmul.msk.bf16.gmra.mxu1 %vm1584_vm4, %v1541_v6  ;;  %vm4027_vm15 = vcmp.eq.f32.partialorder %v999_v52, 8.507059e+37  ;;  %v1002_v21 = vor.u32 1.1754944e-38, %v1001_v41  ;;  %v1017_v53 = vor.u32 1.1754944e-38, %v1016_v40 }
 0x32d   : > { %v2908_v43 = vpop.eup %2907  ;;  %v2661_v4 = vmul.f32 -1.442695, %v888_v42  ;;  %v964_v29 = vadd.f32 %v2904_v58, %v963_v26  ;;  %vm4022_vm14 = vcmp.eq.f32.partialorder %v1014_v33, 8.507059e+37 }
 0x32e   : > { %v2910_v57 = vpop.eup %2909  ;;  %v4009_v60 = vadd.f32 1.0, %v2908_v43  ;;  %v2660_v38 = vmul.f32 -1.442695, %v887_v14 }
 0x32f   : > { %v2912_v6 = vpop.eup %2911  ;;  %2917 = vpow2.f32 %v2661_v4  ;;  %v968_v27 = vsel %vm967_vm12, %v2904_v58, %v964_v29  ;;  %v1006_v49 = vmul.f32 %v2910_v57, %v3990_v8  ;;  %vm1011_vm0 = vweird.f32 %v2910_v57 }
 0x330   : > { %v2914_v1 = vpop.eup %2913  ;;  %2919 = vrcp.f32 %v4009_v60  ;;  %v4018_v15 = vadd.f32 1.0, %v2912_v6  ;;  %v973_v47 = vsel %vm4002_vm10, %v972_v7, %v968_v27  ;;  %v1044_v28 = vand.u32 2147483647, %v4009_v60  ;;  %vm1012_vm2 = vmor %vm1010_vm11, %vm1011_vm0 }
 0x331   : > { %v2916_v35 = vpop.eup %2915  ;;  %2921 = vpow2.f32 %v2660_v38  ;;  %2247 = vperm.xlu1 %2830, %v973_v47   ;;  %v991_v0 = vmul.f32 %v2914_v1, %v3993_v24  ;;  %v1007_v11 = vsub.f32 1.0, %v1006_v49  ;;  %vm996_vm1 = vweird.f32 %v2914_v1 }
 0x332   : > { %2923 = vrcp.f32 %v4018_v15  ;;  %v4032_v51 = vadd.f32 1.0, %v2916_v35  ;;  %v855_v44 = vpop.permute.xlu1 %854  ;;  %vm1040_vm3 = vweird.f32 %v4009_v60  ;;  %vm997_vm8 = vmor %vm995_vm13, %vm996_vm1  ;;  %vm980_vm9 = vweird.f32 %v4018_v15 }
 0x333   : > { %v891_v62 = vadd.f32 %v855_v44, %v3555_v10  ;;  %v853_v16 = vpop.permute.xlu2 %852  ;;  %v992_v31 = vsub.f32 1.0, %v991_v0  ;;  %v1008_v36 = vmul.f32 %v2910_v57, %v1007_v11  ;;  %vm4062_vm11 = vcmp.eq.f32.partialorder %v1044_v28, 8.507059e+37 }
 0x334   : > { %2925 = vrcp.f32 %v4032_v51  ;;  %v890_v17 = vadd.f32 %v853_v16, %v3520_v32  ;;  %v1031_v45 = vand.u32 2147483648, %v4032_v51  ;;  %v1046_v32 = vand.u32 2147483648, %v4009_v60 }
 0x335   : > { %v2918_v5 = vpop.eup %2917  ;;  %v2664_v58 = vmul.f32 -1.442695, %v891_v62  ;;  %v993_v19 = vmul.f32 %v2914_v1, %v992_v31  ;;  %v1009_v55 = vadd.f32 %v2910_v57, %v1008_v36  ;;  %v1029_v59 = vand.u32 2147483647, %v4032_v51 }
 0x336   : > { %v4039_v37 = vpop.eup %2919  ;;  %v4041_v10 = vadd.f32 1.0, %v2918_v5  ;;  %v2663_v18 = vmul.f32 -1.442695, %v890_v17  ;;  %vm1025_vm10 = vweird.f32 %v4032_v51  ;;  %v1032_v33 = vor.u32 1.1754944e-38, %v1031_v45 }
 0x337   : > { %v2922_v23 = vpop.eup %2921  ;;  %2927 = vpow2.f32 %v2664_v58  ;;  %v994_v46 = vadd.f32 %v2914_v1, %v993_v19  ;;  %v1013_v42 = vsel %vm1012_vm2, %v2910_v57, %v1009_v55  ;;  %v1036_v12 = vmul.f32 %v4039_v37, %v4009_v60 }
 0x338   : > { %v4048_v26 = vpop.eup %2923  ;;  %2929 = vrcp.f32 %v4041_v10  ;;  %v4051_v14 = vadd.f32 1.0, %v2922_v23  ;;  %v1018_v8 = vsel %vm4022_vm14, %v1017_v53, %v1013_v42  ;;  %vm4073_vm12 = vcmp.eq.f32.partialorder %v1029_v59, 8.507059e+37 }
 0x339   : > { %2931 = vpow2.f32 %v2663_v18  ;;  %v998_v7 = vsel %vm997_vm8, %v2914_v1, %v994_v46  ;;  %2262 = vperm.xlu1 %2830, %v1018_v8   ;;  %v1037_v52 = vsub.f32 1.0, %v1036_v12  ;;  %v976_v57 = vmul.f32 %v4048_v26, %v4018_v15 }
 0x33a   : > { %v2926_v24 = vpop.eup %2925  ;;  %2933 = vrcp.f32 %v4051_v14  ;;  %v1003_v4 = vsel %vm4027_vm15, %v1002_v21, %v998_v7  ;;  %v861_v29 = vpop.permute.xlu1 %860  ;;  %vm1041_vm13 = vweird.f32 %v4039_v37  ;;  %v1047_v49 = vor.u32 1.1754944e-38, %v1046_v32 }
 0x33b   : > { %2257 = vperm.xlu2 %2832, %v1003_v4   ;;  %v859_v38 = vpop.permute.xlu2 %858  ;;  %v894_v41 = vadd.f32 %v861_v29, %v3688_v3  ;;  %v1543_v40 = vpop.permute.xlu0 %1542  ;;  %v1021_v6 = vmul.f32 %v2926_v24, %v4032_v51  ;;  %v1038_v47 = vmul.f32 %v4039_v37, %v1037_v52  ;;  %v977_v9 = vsub.f32 1.0, %v976_v57 }
 0x33c   : > { %v893_v1 = vadd.f32 %v859_v38, %v3631_v39  ;;  %2724 = vmatmul.msk.bf16.gmra.mxu2 %vm1584_vm4, %v1543_v40  ;;  %2732 = vmatmul.msk.bf16.gmra.mxu3 %vm1584_vm4, %v1543_v40  ;;  %vm981_vm14 = vweird.f32 %v4048_v26  ;;  %v984_v20 = vand.u32 2147483647, %v4018_v15  ;;  %v986_v39 = vand.u32 2147483648, %v4018_v15 }
 0x33d   : > { %v2928_v3 = vpop.eup %2927  ;;  %v2667_v35 = vmul.f32 -1.442695, %v894_v41  ;;  %2740 = vmatmul.msk.bf16.gmra.mxu0 %vm1584_vm4, %v1543_v40  ;;  %2748 = vmatmul.msk.bf16.gmra.mxu1 %vm1584_vm4, %v1543_v40  ;;  %v1022_v0 = vsub.f32 1.0, %v1021_v6  ;;  %v1039_v53 = vadd.f32 %v4039_v37, %v1038_v47  ;;  %v978_v62 = vmul.f32 %v4048_v26, %v977_v9  ;;  %vm1042_vm4 = vmor %vm1040_vm3, %vm1041_vm13 }
 0x33e   : > { %v4087_v11 = vpop.eup %2929  ;;  %v4089_v44 = vadd.f32 1.0, %v2928_v3  ;;  %v2666_v21 = vmul.f32 -1.442695, %v893_v1  ;;  %vm1026_vm15 = vweird.f32 %v2926_v24  ;;  %v987_v36 = vor.u32 1.1754944e-38, %v986_v39  ;;  %vm982_vm0 = vmor %vm980_vm9, %vm981_vm14 }
 0x33f   : > { %v2932_v16 = vpop.eup %2931  ;;  %2935 = vpow2.f32 %v2667_v35  ;;  %v1023_v31 = vmul.f32 %v2926_v24, %v1022_v0  ;;  %v1043_v5 = vsel %vm1042_vm4, %v4039_v37, %v1039_v53  ;;  %v979_v58 = vadd.f32 %v4048_v26, %v978_v62  ;;  %vm1027_vm1 = vmor %vm1025_vm10, %vm1026_vm15 }
 0x340   : > { %v2934_v17 = vpop.eup %2933  ;;  %2937 = vrcp.f32 %v4089_v44  ;;  %v4098_v28 = vadd.f32 1.0, %v2932_v16  ;;  %v1048_v55 = vsel %vm4062_vm11, %v1047_v49, %v1043_v5  ;;  %vm985_vm2 = vcmp.eq.f32.partialorder %v984_v20, 8.507059e+37 }
 0x341   : > { %2939 = vpow2.f32 %v2666_v21  ;;  %v1024_v19 = vadd.f32 %v2926_v24, %v1023_v31  ;;  %v1066_v60 = vmul.f32 %v2934_v17, %v4051_v14  ;;  %2272 = vperm.xlu1 %2830, %v1048_v55   ;;  %v983_v45 = vsel %vm982_vm0, %v4048_v26, %v979_v58 }
 0x342   : > { %2941 = vrcp.f32 %v4098_v28  ;;  %v1074_v37 = vand.u32 2147483647, %v4051_v14  ;;  %v988_v32 = vsel %vm985_vm2, %v987_v36, %v983_v45  ;;  %v1076_v15 = vand.u32 2147483648, %v4051_v14 }
 0x343   : > { %v1028_v18 = vsel %vm1027_vm1, %v2926_v24, %v1024_v19  ;;  %v845_v23 = vpop.permute.xlu0 %844  ;;  %v1067_v46 = vsub.f32 1.0, %v1066_v60  ;;  %2252 = vperm.xlu0 %2831, %v988_v32   ;;  %v1081_v51 = vmul.f32 %v4087_v11, %v4041_v10  ;;  %vm1070_vm3 = vweird.f32 %v4051_v14 }
 0x344   : > { %v1033_v42 = vsel %vm4073_vm12, %v1032_v33, %v1028_v18  ;;  %v886_v59 = vadd.f32 %v845_v23, %v3432_v48  ;;  %vm1071_vm8 = vweird.f32 %v2934_v17  ;;  %vm4125_vm9 = vcmp.eq.f32.partialorder %v1074_v37, 8.507059e+37  ;;  %v4163_v37 = vpop.permute.xlu2 %2023 }
 0x345   : > { %v2936_v8 = vpop.eup %2935  ;;  %2267 = vperm.xlu2 %2832, %v1033_v42   ;;  %v1068_v26 = vmul.f32 %v2934_v17, %v1067_v46  ;;  %v1082_v33 = vsub.f32 1.0, %v1081_v51  ;;  %v1077_v29 = vor.u32 1.1754944e-38, %v1076_v15  ;;  %vm1086_vm10 = vweird.f32 %v4087_v11  ;;  %vm1072_vm11 = vmor %vm1070_vm3, %vm1071_vm8 }
 0x346   : > { %v4121_v12 = vpop.eup %2937  ;;  %v4123_v7 = vadd.f32 1.0, %v2936_v8  ;;  %v2659_v43 = vmul.f32 -1.442695, %v886_v59  ;;  %v1091_v52 = vand.u32 2147483648, %v4041_v10  ;;  %v1089_v40 = vand.u32 2147483647, %v4041_v10  ;;  %v4173_v59 = vpop.permute.xlu1 %2025 }
 0x347   : > { %v2940_v48 = vpop.eup %2939  ;;  %v1069_v4 = vadd.f32 %v2934_v17, %v1068_v26  ;;  %v1083_v41 = vmul.f32 %v4087_v11, %v1082_v33  ;;  %vm1085_vm12 = vweird.f32 %v4041_v10  ;;  %vm1115_vm13 = vweird.f32 %v4098_v28 }
 0x348   : > { %v2942_v57 = vpop.eup %2941  ;;  %v4131_v38 = vadd.f32 1.0, %v2940_v48  ;;  %2943 = vrcp.f32 %v4123_v7  ;;  %vm1087_vm14 = vmor %vm1085_vm12, %vm1086_vm10  ;;  %v1092_v9 = vor.u32 1.1754944e-38, %v1091_v52  ;;  %v1119_v10 = vand.u32 2147483647, %v4098_v28 }
 0x349   : > { %2945 = vpow2.f32 %v2659_v43  ;;  %v1716_v6 = vpop.f32.mrf.mxu0  ;;  %v1073_v27 = vsel %vm1072_vm11, %v2934_v17, %v1069_v4  ;;  %v1111_v49 = vmul.f32 %v2942_v57, %v4098_v28  ;;  %v1084_v47 = vadd.f32 %v4087_v11, %v1083_v41  ;;  %v1765_v14 = vpop.f32.mrf.mxu1 }
 0x34a   : > { %2947 = vrcp.f32 %v4131_v38  ;;  %v1078_v1 = vsel %vm4125_vm9, %v1077_v29, %v1073_v27  ;;  %v1126_v0 = vmul.f32 %v4121_v12, %v4089_v44  ;;  %vm1090_vm15 = vcmp.eq.f32.partialorder %v1089_v40, 8.507059e+37 }
 0x34b   : > { %v851_v3 = vpop.permute.xlu0 %850  ;;  %v1112_v35 = vsub.f32 1.0, %v1111_v49  ;;  %v1088_v20 = vsel %vm1087_vm14, %v4087_v11, %v1084_v47  ;;  %v1121_v21 = vand.u32 2147483648, %v4098_v28  ;;  %vm1116_vm4 = vweird.f32 %v2942_v57 }
 0x34c   : > { %v889_v39 = vadd.f32 %v851_v3, %v3479_v13  ;;  %v1093_v53 = vsel %vm1090_vm15, %v1092_v9, %v1088_v20  ;;  %v1127_v16 = vsub.f32 1.0, %v1126_v0  ;;  %vm1131_vm0 = vweird.f32 %v4121_v12  ;;  %vm1117_vm1 = vmor %vm1115_vm13, %vm1116_vm4 }
 0x34d   : > { %2282 = vperm.xlu2 %2832, %v1078_v1   ;;  %v1113_v62 = vmul.f32 %v2942_v57, %v1112_v35  ;;  %2287 = vperm.xlu1 %2830, %v1093_v53   ;;  %v1134_v11 = vand.u32 2147483647, %v4089_v44  ;;  %v1136_v58 = vand.u32 2147483648, %v4089_v44  ;;  %vm1120_vm2 = vcmp.eq.f32.partialorder %v1119_v10, 8.507059e+37  ;;  %v2045_v53 = vpop.permute.xlu2 %2044 }
 0x34e   : > { %v4153_v31 = vpop.eup %2943  ;;  %v2662_v36 = vmul.f32 -1.442695, %v889_v39  ;;  %v1618_v17 = vpop.f32.mrf.mxu2  ;;  %v1128_v45 = vmul.f32 %v4121_v12, %v1127_v16  ;;  %v1122_v23 = vor.u32 1.1754944e-38, %v1121_v21  ;;  %vm1130_vm3 = vweird.f32 %v4089_v44  ;;  %v2032_v21 = vld [vmem:[%s4628_s7] ss:$8 sm:$0x3] }
 0x34f   : > { %v1667_v5 = vpop.f32.mrf.mxu3  ;;  %v2946_v13 = vpop.eup %2945  ;;  %v4158_v19 = vmul.f32 %v1716_v6, %v1618_v17  ;;  %v1114_v60 = vadd.f32 %v2942_v57, %v1113_v62  ;;  %vm1132_vm8 = vmor %vm1130_vm3, %vm1131_vm0  ;;  %v1137_v8 = vor.u32 1.1754944e-38, %v1136_v58  ;;  %vm1135_vm9 = vcmp.eq.f32.partialorder %v1134_v11, 8.507059e+37 }
 0x350   : > { %v4160_v55 = vmul.f32 %v1765_v14, %v1667_v5  ;;  %v2948_v18 = vpop.eup %2947  ;;  %v4165_v32 = vadd.f32 1.0, %v2946_v13  ;;  %2949 = vpow2.f32 %v2662_v36  ;;  %v1129_v15 = vadd.f32 %v4121_v12, %v1128_v45  ;;  %v4211_v11 = vpop.permute.xlu1 %2060 }
 0x351   : > { %v1118_v46 = vsel %vm1117_vm1, %v2942_v57, %v1114_v60  ;;  %v1156_v42 = vmul.f32 %v2948_v18, %v4131_v38  ;;  %v1718_v28 = vpop.f32.mrf.mxu0  ;;  %v1171_v44 = vmul.f32 %v4153_v31, %v4123_v7  ;;  %vm1160_vm10 = vweird.f32 %v4131_v38  ;;  %v1767_v29 = vpop.f32.mrf.mxu1 }
 0x352   : > { %2951 = vrcp.f32 %v4165_v32  ;;  %v1123_v51 = vsel %vm1120_vm2, %v1122_v23, %v1118_v46  ;;  %v1133_v26 = vsel %vm1132_vm8, %v4121_v12, %v1129_v15  ;;  %v1166_v4 = vand.u32 2147483648, %v4131_v38  ;;  %v2749_v15 = vld [vmem:[%s4628_s7 + $0x1] ss:$8 sm:$0x3] }
 0x353   : > { %v857_v43 = vpop.permute.xlu0 %856  ;;  %v1157_v24 = vsub.f32 1.0, %v1156_v42  ;;  %v1138_v33 = vsel %vm1135_vm9, %v1137_v8, %v1133_v26  ;;  %vm1161_vm11 = vweird.f32 %v2948_v18  ;;  %v1164_v57 = vand.u32 2147483647, %v4131_v38 }
 0x354   : > { %v892_v48 = vadd.f32 %v857_v43, %v3584_v22  ;;  %v1172_v12 = vsub.f32 1.0, %v1171_v44  ;;  %v1179_v49 = vand.u32 2147483647, %v4123_v7  ;;  %v1181_v22 = vand.u32 2147483648, %v4123_v7  ;;  %vm1162_vm12 = vmor %vm1160_vm10, %vm1161_vm11 }
 0x355   : > { %2297 = vperm.xlu2 %2832, %v1123_v51   ;;  %v1158_v52 = vmul.f32 %v2948_v18, %v1157_v24  ;;  %2302 = vperm.xlu1 %2830, %v1138_v33   ;;  %v2027_v1 = vlaneseq  ;;  %v1167_v10 = vor.u32 1.1754944e-38, %v1166_v4  ;;  %vm1176_vm13 = vweird.f32 %v4153_v31 }
 0x356   : > { %v2950_v41 = vpop.eup %2949  ;;  %v2665_v40 = vmul.f32 -1.442695, %v892_v48  ;;  %v1620_v6 = vpop.f32.mrf.mxu2  ;;  %v1173_v0 = vmul.f32 %v4153_v31, %v1172_v12  ;;  %vm1165_vm14 = vcmp.eq.f32.partialorder %v1164_v57, 8.507059e+37  ;;  %vm1175_vm15 = vweird.f32 %v4123_v7  ;;  %v2751_v12 = vld [vmem:[%s4628_s7 + $0x3] ss:$8 sm:$0x3] }
 0x357   : > { %v1669_v27 = vpop.f32.mrf.mxu3  ;;  %v4187_v47 = vadd.f32 1.0, %v2950_v41  ;;  %v4189_v14 = vmul.f32 %v1718_v28, %v1620_v6  ;;  %v1159_v3 = vadd.f32 %v2948_v18, %v1158_v52  ;;  %v4201_v39 = vand.u32 127, %v2027_v1  ;;  %vm1177_vm4 = vmor %vm1175_vm15, %vm1176_vm13 }
 0x358   : > { %v4191_v9 = vmul.f32 %v1767_v29, %v1669_v27  ;;  %v4193_v35 = vpop.eup %2951  ;;  %2953 = vpow2.f32 %v2665_v40  ;;  %v1174_v38 = vadd.f32 %v4153_v31, %v1173_v0  ;;  %vm1180_vm0 = vcmp.eq.f32.partialorder %v1179_v49, 8.507059e+37  ;;  %v2079_v49 = vpop.permute.xlu2 %2078 }
 0x359   : > { %2955 = vrcp.f32 %v4187_v47  ;;  %v1163_v20 = vsel %vm1162_vm12, %v2948_v18, %v1159_v3  ;;  %v1051_v16 = vmul.f32 %v4193_v35, %v4165_v32  ;;  %v1182_v36 = vor.u32 1.1754944e-38, %v1181_v22  ;;  %v4217_v45 = vpop.f32.mrf.mxu0  ;;  %v4237_v24 = vpop.f32.mrf.mxu1 }
 0x35a   : > { %v1168_v62 = vsel %vm1165_vm14, %v1167_v10, %v1163_v20  ;;  %vm2029_vm1 = vcmp.lt.s32.totalorder %v4201_v39, 17  ;;  %v2034_v5 = vperm.slane %v2032_v21, 0  ;;  %v1178_v58 = vsel %vm1177_vm4, %v4153_v31, %v1174_v38  ;;  %v2081_v20 = vpop.permute.xlu1 %2080 }
 0x35b   : > { %v863_v17 = vpop.permute.xlu0 %862  ;;  %v2035_v60 = vperm.slane %v2032_v21, 1  ;;  %v2031_v7 = vsel %vm2029_vm1, %v4173_v59, %v4163_v37  ;;  %v1183_v18 = vsel %vm1180_vm0, %v1182_v36, %v1178_v58  ;;  %v2030_v23 = vsel %vm2029_vm1, %v4163_v37, %v4173_v59 }
 0x35c   : > { %v895_v13 = vadd.f32 %v863_v17, %v3782_v50  ;;  %v1052_v46 = vsub.f32 1.0, %v1051_v16  ;;  %vm1055_vm2 = vweird.f32 %v4165_v32  ;;  %v1059_v8 = vand.u32 2147483647, %v4165_v32 }
 0x35d   : > { %2312 = vperm.xlu2 %2832, %v1168_v62   ;;  %2317 = vperm.xlu1 %2830, %v1183_v18   ;;  %v1061_v28 = vand.u32 2147483648, %v4165_v32  ;;  %v2038_v59 = vmul.f32 %v2034_v5, %v2031_v7  ;;  %vm1056_vm3 = vweird.f32 %v4193_v35  ;;  %v2039_v44 = vmul.f32 %v2035_v60, %v2030_v23 }
 0x35e   : > { %v2954_v42 = vpop.eup %2953  ;;  %v2668_v31 = vmul.f32 -1.442695, %v895_v13  ;;  %v4224_v50 = vpop.f32.mrf.mxu2  ;;  %v1053_v43 = vmul.f32 %v4193_v35, %v1052_v46  ;;  %vm2046_vm8 = vcmp.lt.s32.totalorder %v4201_v39, 16  ;;  %v2052_v4 = vperm.slane %v2749_v15, 0  ;;  %vm1057_vm9 = vmor %vm1055_vm2, %vm1056_vm3 }
 0x35f   : > { %v4226_v51 = vpop.f32.mrf.mxu3  ;;  %v4231_v26 = vpop.eup %2955  ;;  %v4233_v37 = vadd.f32 1.0, %v2954_v42  ;;  %v2053_v29 = vperm.slane %v2749_v15, 1  ;;  %vm1060_vm10 = vcmp.eq.f32.partialorder %v1059_v8, 8.507059e+37  ;;  %v1062_v52 = vor.u32 1.1754944e-38, %v1061_v28 }
 0x360   : > { %2957 = vpow2.f32 %v2668_v31  ;;  %v1096_v33 = vmul.f32 %v4231_v26, %v4187_v47  ;;  %v1054_v48 = vadd.f32 %v4193_v35, %v1053_v43  ;;  %vm1101_vm11 = vweird.f32 %v4231_v26  ;;  %v2752_v42 = vld [vmem:[%s4628_s7 + $0x4] ss:$8 sm:$0x3] }
 0x361   : > { %2959 = vrcp.f32 %v4233_v37  ;;  %v1104_v6 = vand.u32 2147483647, %v4187_v47  ;;  %v1106_v27 = vand.u32 2147483648, %v4187_v47  ;;  %vm2082_vm12 = vcmp.lt.s32.totalorder %v4201_v39, 1  ;;  %v4279_v60 = vpop.f32.mrf.mxu0 }
 0x362   : > { %v1097_v57 = vsub.f32 1.0, %v1096_v33  ;;  %v1058_v41 = vsel %vm1057_vm9, %v4193_v35, %v1054_v48  ;;  %v2750_v35 = vld [vmem:[%s4628_s7 + $0x2] ss:$8 sm:$0x3]  ;;  %vm1100_vm13 = vweird.f32 %v4187_v47  ;;  %vm2064_vm14 = vcmp.lt.s32.totalorder %v4201_v39, 15 }
 0x363   : > { %v2043_v40 = vpop.permute.xlu0 %2042  ;;  %v1063_v32 = vsel %vm1060_vm10, %v1062_v52, %v1058_v41  ;;  %v2088_v38 = vperm.slane %v2751_v12, 0  ;;  %v2089_v16 = vperm.slane %v2751_v12, 1  ;;  %vm4275_vm15 = vmor %vm1100_vm13, %vm1101_vm11  ;;  %vm1105_vm4 = vcmp.eq.f32.partialorder %v1104_v6, 8.507059e+37  ;;  %v2753_v47 = vld [vmem:[%s4628_s7 + $0x5] ss:$8 sm:$0x3] }
 0x364   : > { %v2047_v22 = vsel %vm2046_vm8, %v2043_v40, %v2045_v53  ;;  %v2048_v1 = vsel %vm2046_vm8, %v2045_v53, %v2043_v40  ;;  %v1098_v3 = vmul.f32 %v4231_v26, %v1097_v57  ;;  %2277 = vperm.xlu0 %2831, %v1063_v32   ;;  %v2083_v53 = vsel %vm2082_vm12, %v2079_v49, %v2081_v20 }
 0x365   : > { %v2056_v10 = vmul.f32 %v2052_v4, %v2048_v1  ;;  %v2057_v0 = vmul.f32 %v2053_v29, %v2047_v22  ;;  %v2070_v58 = vperm.slane %v2750_v35, 0  ;;  %v2071_v13 = vperm.slane %v2750_v35, 1 }
 0x366   : > { %v2958_v21 = vpop.eup %2957  ;;  %v1099_v62 = vadd.f32 %v4231_v26, %v1098_v3  ;;  %v4271_v5 = vpop.f32.mrf.mxu2  ;;  %v1107_v46 = vor.u32 1.1754944e-38, %v1106_v27  ;;  %v2084_v15 = vsel %vm2082_vm12, %v2081_v20, %v2079_v49  ;;  %v2093_v8 = vmul.f32 %v2089_v16, %v2083_v53 }
 0x367   : > { %v4267_v36 = vpop.eup %2959  ;;  %v4269_v17 = vadd.f32 1.0, %v2958_v21  ;;  %v2058_v7 = vadd.f32 %v2056_v10, %v2038_v59  ;;  %v4281_v18 = vpop.f32.mrf.mxu3  ;;  %v2059_v31 = vadd.f32 %v2057_v0, %v2039_v44  ;;  %v2092_v33 = vmul.f32 %v2088_v38, %v2084_v15 }
 0x368   : > { %v1103_v23 = vsel %vm4275_vm15, %v4231_v26, %v1099_v62  ;;  %v1141_v28 = vmul.f32 %v4267_v36, %v4233_v37  ;;  %v4294_v59 = vpop.f32.mrf.mxu1  ;;  %v1149_v26 = vand.u32 2147483647, %v4233_v37  ;;  %v1151_v48 = vand.u32 2147483648, %v4233_v37  ;;  %v2138_v49 = vpop.permute.xlu2 %2137 }
 0x369   : > { %2961 = vrcp.f32 %v4269_v17  ;;  %v1108_v43 = vsel %vm1105_vm4, %v1107_v46, %v1103_v23  ;;  %vm1145_vm0 = vweird.f32 %v4233_v37  ;;  %v2099_v52 = vperm.slane %v2752_v42, 0  ;;  %v4319_v21 = vpop.permute.xlu1 %2153 }
 0x36a   : > { %v1142_v29 = vsub.f32 1.0, %v1141_v28  ;;  %v2100_v57 = vperm.slane %v2752_v42, 1  ;;  %vm1146_vm1 = vweird.f32 %v4267_v36  ;;  %vm2139_vm2 = vcmp.lt.s32.totalorder %v4201_v39, 127 }
 0x36b   : > { %v2063_v4 = vpop.permute.xlu0 %2062  ;;  %vm4308_vm3 = vcmp.eq.f32.partialorder %v1149_v26, 8.507059e+37  ;;  %v1152_v32 = vor.u32 1.1754944e-38, %v1151_v48  ;;  %v2105_v22 = vmul.f32 %v2099_v52, %v3931_v61  ;;  %v2103_v0 = vmul.f32 %v2099_v52, %v3927_v63  ;;  %vm1147_vm8 = vmor %vm1145_vm0, %vm1146_vm1 }
 0x36c   : > { %v2065_v44 = vsel %vm2064_vm14, %v4211_v11, %v2063_v4  ;;  %v2066_v12 = vsel %vm2064_vm14, %v2063_v4, %v4211_v11  ;;  %2292 = vperm.xlu0 %2831, %v1108_v43   ;;  %v1143_v6 = vmul.f32 %v4267_v36, %v1142_v29  ;;  %v2106_v1 = vmul.f32 %v2100_v57, %v3911_v56 }
 0x36d   : > { %v2074_v41 = vmul.f32 %v2070_v58, %v2066_v12  ;;  %v2075_v40 = vmul.f32 %v2071_v13, %v2065_v44  ;;  %v2107_v11 = vmul.f32 %v2099_v52, %v3939_v54  ;;  %v2104_v20 = vmul.f32 %v2100_v57, %v3896_v30 }
 0x36e   : > { %v1144_v62 = vadd.f32 %v4267_v36, %v1143_v6  ;;  %v2108_v38 = vmul.f32 %v2100_v57, %v3916_v2  ;;  %v2109_v61 = vmul.f32 %v2099_v52, %v3946_v25  ;;  %v2110_v56 = vmul.f32 %v2100_v57, %v3922_v34  ;;  %v4325_v16 = vpop.f32.mrf.mxu2  ;;  %v4334_v2 = vpop.f32.mrf.mxu0 }
 0x36f   : > { %v4315_v3 = vpop.eup %2961  ;;  %v2076_v35 = vadd.f32 %v2074_v41, %v2058_v7  ;;  %v2077_v10 = vadd.f32 %v2075_v40, %v2059_v31  ;;  %v2119_v30 = vrot.slane %v2105_v22, 7  ;;  %v2121_v63 = vrot.slane %v2107_v11, 6  ;;  %v4336_v25 = vpop.f32.mrf.mxu3  ;;  %v2754_v40 = vld [vmem:[%s4628_s7 + $0x6] ss:$8 sm:$0x3] }
 0x370   : > { %v1148_v34 = vsel %vm1147_vm8, %v4267_v36, %v1144_v62  ;;  %v2123_v58 = vrot.slane %v2109_v61, 5  ;;  %v2125_v13 = vrot.slane %v2106_v1, 7  ;;  %v2127_v7 = vrot.slane %v2108_v38, 6  ;;  %v4342_v31 = vpop.f32.mrf.mxu1  ;;  %v2172_v41 = vpop.permute.xlu2 %2171 }
 0x371   : > { %v2094_v54 = vadd.f32 %v2092_v33, %v2076_v35  ;;  %v2095_v53 = vadd.f32 %v2093_v8, %v2077_v10  ;;  %v1153_v23 = vsel %vm4308_vm3, %v1152_v32, %v1148_v34  ;;  %v2120_v37 = vsel %vm2012_vm5, %v2119_v30, %v2103_v0  ;;  %v2174_v1 = vpop.permute.xlu1 %2173 }
 0x372   : > { %v2129_v46 = vrot.slane %v2110_v56, 5  ;;  %v2145_v15 = vperm.slane %v2753_v47, 0  ;;  %v2122_v8 = vsel %vm2014_vm6, %v2121_v63, %v2120_v37  ;;  %v2126_v28 = vsel %vm2012_vm5, %v2125_v13, %v2104_v20 }
 0x373   : > { %v2136_v42 = vpop.permute.xlu0 %2135  ;;  %v2146_v43 = vperm.slane %v2753_v47, 1  ;;  %v2124_v33 = vsel %vm2016_vm7, %v2123_v58, %v2122_v8  ;;  %v2128_v26 = vsel %vm2014_vm6, %v2127_v7, %v2126_v28  ;;  %v1186_v57 = vmul.f32 %v4315_v3, %v4269_v17 }
 0x374   : > { %v2140_v36 = vsel %vm2139_vm2, %v2136_v42, %v2138_v49  ;;  %2307 = vperm.xlu0 %2831, %v1153_v23   ;;  %v2141_v48 = vsel %vm2139_vm2, %v2138_v49, %v2136_v42  ;;  %v2130_v29 = vsel %vm2016_vm7, %v2129_v46, %v2128_v26  ;;  %v2133_v52 = vadd.f32 %v2124_v33, %v2094_v54  ;;  %v2755_v49 = vld [vmem:[%s4628_s7 + $0x7] ss:$8 sm:$0x3] }
 0x375   : > { %v2149_v4 = vmul.f32 %v2145_v15, %v2140_v36  ;;  %v2134_v44 = vadd.f32 %v2130_v29, %v2095_v53  ;;  %v2150_v12 = vmul.f32 %v2146_v43, %v2141_v48  ;;  %v1187_v27 = vsub.f32 1.0, %v1186_v57  ;;  %v2756_v15 = vld [vmem:[%s4628_s7 + $0x10] ss:$8 sm:$0x3] }
 0x376   : > { %vm1190_vm9 = vweird.f32 %v4269_v17  ;;  %vm1191_vm10 = vweird.f32 %v4315_v3  ;;  %v1196_v32 = vand.u32 2147483648, %v4269_v17  ;;  %vm2157_vm11 = vcmp.lt.s32.totalorder %v4201_v39, 113  ;;  %v4368_v20 = vpop.f32.mrf.mxu2  ;;  %v4370_v54 = vpop.f32.mrf.mxu0 }
 0x377   : > { %v2151_v6 = vadd.f32 %v2149_v4, %v2133_v52  ;;  %v2163_v22 = vperm.slane %v2754_v40, 0  ;;  %v1188_v11 = vmul.f32 %v4315_v3, %v1187_v27  ;;  %v1194_v35 = vand.u32 2147483647, %v4269_v17  ;;  %v4372_v53 = vpop.f32.mrf.mxu3  ;;  %vm1192_vm13 = vmor %vm1190_vm9, %vm1191_vm10 }
 0x378   : > { %v2164_v10 = vperm.slane %v2754_v40, 1  ;;  %vm2175_vm12 = vcmp.lt.s32.totalorder %v4201_v39, 112  ;;  %v2152_v0 = vadd.f32 %v2150_v12, %v2134_v44  ;;  %v2181_v38 = vperm.slane %v2755_v49, 0  ;;  %v4385_v23 = vpop.f32.mrf.mxu1  ;;  %v2192_v17 = vpop.permute.xlu2 %2191 }
 0x379   : > { %v2182_v61 = vperm.slane %v2755_v49, 1  ;;  %v2176_v56 = vsel %vm2175_vm12, %v2172_v41, %v2174_v1  ;;  %v1189_v30 = vadd.f32 %v4315_v3, %v1188_v11  ;;  %v2177_v34 = vsel %vm2175_vm12, %v2174_v1, %v2172_v41 }
 0x37a   : > { %v1197_v58 = vor.u32 1.1754944e-38, %v1196_v32  ;;  %vm1195_vm14 = vcmp.eq.f32.partialorder %v1194_v35, 8.507059e+37  ;;  %v2185_v46 = vmul.f32 %v2181_v38, %v2176_v56  ;;  %vm2193_vm15 = vcmp.lt.s32.totalorder %v4201_v39, 111 }
 0x37b   : > { %v2156_v62 = vpop.permute.xlu0 %2155  ;;  %v1193_v37 = vsel %vm1192_vm13, %v4315_v3, %v1189_v30  ;;  %v2186_v28 = vmul.f32 %v2182_v61, %v2177_v34  ;;  %v2199_v43 = vperm.slane %v2756_v15, 0  ;;  %v2200_v36 = vperm.slane %v2756_v15, 1 }
 0x37c   : > { %v2158_v63 = vsel %vm2157_vm11, %v4319_v21, %v2156_v62  ;;  %v2159_v47 = vsel %vm2157_vm11, %v2156_v62, %v4319_v21  ;;  %v1198_v21 = vsel %vm1195_vm14, %v1197_v58, %v1193_v37  ;;  %vm2360_vm11 = vcmask 1040384  }
 0x37d   : > { %v2167_v13 = vmul.f32 %v2163_v22, %v2158_v63  ;;  %v2168_v7 = vmul.f32 %v2164_v10, %v2159_v47  ;;  %2322 = vperm.xlu0 %2831, %v1198_v21  }
 0x37e   : > { %v4392_v29 = vpop.f32.mrf.mxu2  ;;  %v4394_v44 = vpop.f32.mrf.mxu0 }
 0x37f   : > { %v2169_v42 = vadd.f32 %v2167_v13, %v2151_v6  ;;  %v2170_v8 = vadd.f32 %v2168_v7, %v2152_v0  ;;  %v4396_v12 = vpop.f32.mrf.mxu3 }
 0x380   : > { %v4398_v6 = vpop.f32.mrf.mxu1 }
 0x381   : > { %v2187_v33 = vadd.f32 %v2185_v46, %v2169_v42  ;;  %v2188_v26 = vadd.f32 %v2186_v28, %v2170_v8 }
 0x383   : > { %v2190_v48 = vpop.permute.xlu0 %2189 }
 0x384   : > { %v2194_v3 = vsel %vm2193_vm15, %v2190_v48, %v2192_v17  ;;  %v2195_v4 = vsel %vm2193_vm15, %v2192_v17, %v2190_v48 }
 0x385   : > { %v2203_v52 = vmul.f32 %v2199_v43, %v2194_v3  ;;  %v2204_v57 = vmul.f32 %v2200_v36, %v2195_v4 }
 0x386   : > { %v4400_v49 = vpop.f32.mrf.mxu2  ;;  %v4402_v32 = vpop.f32.mrf.mxu0 }
 0x387   : > { %v2205_v41 = vadd.f32 %v2203_v52, %v2187_v33  ;;  %v2206_v40 = vadd.f32 %v2204_v57, %v2188_v26  ;;  %v4404_v22 = vpop.f32.mrf.mxu3 }
 0x388   : > { %v4406_v35 = vpop.f32.mrf.mxu1 }
 0x389   : > { %v2757_v39 = vmul.f32 -1.442695, %v2205_v41  ;;  %v2758_v27 = vmul.f32 -1.442695, %v2206_v40 }
 0x38b   : > { %2963 = vpow2.f32 %v2757_v39 }
 0x38c   : > { %2965 = vpow2.f32 %v2758_v27 }
 0x38e   : > { %v4408_v62 = vpop.f32.mrf.mxu2  ;;  %v4410_v61 = vpop.f32.mrf.mxu0 }
 0x38f   : > { %v4412_v56 = vpop.f32.mrf.mxu3 }
 0x390   : > { %v4414_v58 = vpop.f32.mrf.mxu1 }
 0x391   : > { %v2964_v1 = vpop.eup %2963 }
 0x392   : > { %v2966_v11 = vpop.eup %2965  ;;  %v2213_v10 = vadd.f32 1.0, %v2964_v1 }
 0x393   : > { %v2214_v0 = vadd.f32 1.0, %v2966_v11 }
 0x394   : > { %2967 = vrcp.f32 %v2213_v10  ;;  %vm2220_vm4 = vweird.f32 %v2213_v10  ;;  %v2226_v47 = vand.u32 2147483648, %v2213_v10  ;;  %v2224_v37 = vand.u32 2147483647, %v2213_v10 }
 0x395   : > { %2969 = vrcp.f32 %v2214_v0  ;;  %v2241_v7 = vand.u32 2147483648, %v2214_v0  ;;  %vm2235_vm1 = vweird.f32 %v2214_v0  ;;  %v2239_v15 = vand.u32 2147483647, %v2214_v0  ;;  %v2258_v21 = vpop.permute.xlu2 %2257 }
 0x396   : > { %v2227_v17 = vor.u32 1.1754944e-38, %v2226_v47  ;;  %vm2225_vm10 = vcmp.eq.f32.partialorder %v2224_v37, 8.507059e+37  ;;  %v4422_v48 = vpop.f32.mrf.mxu2  ;;  %v4424_v52 = vpop.f32.mrf.mxu0  ;;  %v1810_v47 = vmul.f32 %v4237_v24, %v4226_v51  ;;  %v1813_v51 = vmul.f32 %v4334_v2, %v4325_v16  ;;  %v2990_v2 = vld [vmem:[%s3124_s23 + $0x8] sm:$0xff] }
 0x397   : > { %v2242_v43 = vor.u32 1.1754944e-38, %v2241_v7  ;;  %vm2240_vm9 = vcmp.eq.f32.partialorder %v2239_v15, 8.507059e+37  ;;  %v4426_v57 = vpop.f32.mrf.mxu3  ;;  %v2987_v7 = vld [vmem:[%s3124_s23 + $0x20] sm:$0xff]  ;;  %v1814_v24 = vmul.f32 %v4342_v31, %v4336_v25 }
 0x398   : > { %v4432_v27 = vpop.f32.mrf.mxu1  ;;  %v2329_v37 = vmul.f32 %v2987_v7, %v2258_v21  ;;  %v2991_v31 = vld [vmem:[%s3124_s23 + $0x40] sm:$0xff] }
 0x39a   : > { %v2968_v38 = vpop.eup %2967 }
 0x39b   : > { %v2970_v30 = vpop.eup %2969  ;;  %v2216_v63 = vmul.f32 %v2968_v38, %v2213_v10  ;;  %vm2221_vm0 = vweird.f32 %v2968_v38 }
 0x39c   : > { %v2231_v34 = vmul.f32 %v2970_v30, %v2214_v0  ;;  %vm2236_vm2 = vweird.f32 %v2970_v30  ;;  %vm4416_vm3 = vmor %vm2220_vm4, %vm2221_vm0 }
 0x39d   : > { %v2217_v13 = vsub.f32 1.0, %v2216_v63  ;;  %vm2237_vm8 = vmor %vm2235_vm1, %vm2236_vm2  ;;  %v1809_v63 = vmul.f32 %v4217_v45, %v4224_v50 }
 0x39e   : > { %v2232_v46 = vsub.f32 1.0, %v2231_v34 }
 0x39f   : > { %v2218_v42 = vmul.f32 %v2968_v38, %v2217_v13  ;;  %v2268_v10 = vpop.permute.xlu2 %2267 }
 0x3a0   : > { %v2233_v28 = vmul.f32 %v2970_v30, %v2232_v46  ;;  %v2988_v46 = vld [vmem:[%s3124_s23 + $0x28] sm:$0xff] }
 0x3a1   : > { %v2219_v36 = vadd.f32 %v2968_v38, %v2218_v42  ;;  %v2330_v15 = vmul.f32 %v2988_v46, %v2258_v21  ;;  %v4470_v21 = vpop.f32.mrf.mxu2  ;;  %v1820_v46 = vmul.f32 %v4406_v35, %v4404_v22  ;;  %v1816_v22 = vmul.f32 %v4385_v23, %v4372_v53  ;;  %v2998_v23 = vld [vmem:[%s3124_s23 + $0x58] sm:$0xff] }
 0x3a2   : > { %v2234_v33 = vadd.f32 %v2970_v30, %v2233_v28 }
 0x3a3   : > { %v2223_v26 = vsel %vm4416_vm3, %v2968_v38, %v2219_v36  ;;  %v2248_v3 = vpop.permute.xlu1 %2247  ;;  %v2989_v36 = vld [vmem:[%s3124_s23] sm:$0xff] }
 0x3a4   : > { %v2238_v4 = vsel %vm2237_vm8, %v2970_v30, %v2234_v33  ;;  %v4428_v41 = vsel %vm2225_vm10, %v2227_v17, %v2223_v26  ;;  %v2325_v16 = vmul.f32 %v2989_v36, %v2248_v3  ;;  %v2326_v25 = vmul.f32 %v2990_v2, %v2248_v3  ;;  %v2992_v26 = vld [vmem:[%s3124_s23 + $0x48] sm:$0xff] }
 0x3a5   : > { %v2243_v40 = vsel %vm2240_vm9, %v2242_v43, %v2238_v4  ;;  %v4472_v43 = vpop.f32.mrf.mxu0  ;;  %v2333_v33 = vmul.f32 %v2991_v31, %v2268_v10  ;;  %v2334_v4 = vmul.f32 %v2992_v26, %v2268_v10  ;;  %v1819_v10 = vmul.f32 %v4402_v32, %v4400_v49  ;;  %v2999_v26 = vld [vmem:[%s3124_s23 + $0x10] sm:$0xff] }
 0x3a6   : > { %v4430_v39 = vrot.slane %v2243_v40, 7  ;;  %v1815_v32 = vmul.f32 %v4370_v54, %v4368_v20  ;;  %v2996_v20 = vld [vmem:[%s3124_s23 + $0x78] sm:$0xff] }
 0x3a8   : > { %v2362_v1 = vsel %vm2012_vm5, %v4428_v41, %v4430_v39  ;;  %v2361_v11 = vsel %vm2360_vm11, %v4428_v41, %v4430_v39 }
 0x3a9   : > { %v2363_v0 = vrot.slane %v2362_v1, 1  ;;  %v4439_v38 = vperm.slane %v2361_v11, 0  ;;  %v4441_v30 = vperm.slane %v2361_v11, 1  ;;  %v1811_v11 = vmul.f32 %v4279_v60, %v4271_v5  ;;  %v2283_v5 = vpop.permute.xlu2 %2282  ;;  %v2993_v60 = vld [vmem:[%s3124_s23 + $0x30] sm:$0xff]  ;;  %v1645_v31 = vpop.f32.mrf.mxu2 }
 0x3aa   : > { %v2340_v54 = vmul.f32 %v2996_v20, %v2283_v5  ;;  %v3003_v20 = vld [vmem:[%s3124_s23 + $0xb0] sm:$0xff] }
 0x3ab   : > { %v4447_v34 = vperm.slane %v2363_v0, 0  ;;  %v4449_v13 = vperm.slane %v2363_v0, 1  ;;  %v2263_v42 = vpop.permute.xlu1 %2262  ;;  %v2388_v8 = vadd.f32 %v4439_v38, %v1809_v63  ;;  %v2389_v28 = vadd.f32 %v4441_v30, %v1810_v47  ;;  %v4485_v0 = vpop.f32.mrf.mxu1 }
 0x3ac   : > { %v2384_v45 = vadd.f32 %v4439_v38, %v4158_v19  ;;  %v2385_v50 = vadd.f32 %v4441_v30, %v4160_v55  ;;  %v4474_v55 = vpop.f32.mrf.mxu3  ;;  %v1812_v47 = vmul.f32 %v4294_v59, %v4281_v18  ;;  %v2390_v59 = vadd.f32 %v4439_v38, %v1811_v11 }
 0x3ad   : > { %v2420_v19 = vmul.f32 %v2388_v8, %v2329_v37  ;;  %v2421_v17 = vmul.f32 %v2389_v28, %v2330_v15  ;;  %v2392_v40 = vadd.f32 %v4447_v34, %v1813_v51  ;;  %v2393_v1 = vadd.f32 %v4449_v13, %v1814_v24  ;;  %v2994_v8 = vld [vmem:[%s3124_s23 + $0x38] sm:$0xff]  ;;  %v1743_v11 = vpop.f32.mrf.mxu0 }
 0x3ae   : > { %v2416_v63 = vmul.f32 %v2384_v45, %v2325_v16  ;;  %v2417_v3 = vmul.f32 %v2385_v50, %v2326_v25  ;;  %v2331_v15 = vmul.f32 %v2993_v60, %v2263_v42  ;;  %v2332_v28 = vmul.f32 %v2994_v8, %v2263_v42  ;;  %v2995_v50 = vld [vmem:[%s3124_s23 + $0x70] sm:$0xff] }
 0x3af   : > { %2452 = vst [vmem:[%s4468_s19 + $0x20] sm:$0xff] %v2420_v19  ;;  %v2424_v7 = vmul.f32 %v2392_v40, %v2333_v33  ;;  %v2425_v37 = vmul.f32 %v2393_v1, %v2334_v4  ;;  %v2398_v18 = vadd.f32 %v4447_v34, %v1819_v10  ;;  %v2391_v49 = vadd.f32 %v4441_v30, %v1812_v47  ;;  %v3000_v40 = vld [vmem:[%s3124_s23 + $0x18] sm:$0xff] }
 0x3b0   : > { %2453 = vst [vmem:[%s4468_s19 + $0x28] sm:$0xff] %v2421_v17  ;;  %v2399_v35 = vadd.f32 %v4449_v13, %v1820_v46  ;;  %v2364_v45 = vsel %vm2014_vm6, %v4428_v41, %v4430_v39  ;;  %v2339_v51 = vmul.f32 %v2995_v50, %v2283_v5  ;;  %v2422_v24 = vmul.f32 %v2390_v59, %v2331_v15  ;;  %v2997_v17 = vld [vmem:[%s3124_s23 + $0x50] sm:$0xff] }
 0x3b1   : > { %2448 = vst [vmem:[%s4468_s19] sm:$0xff] %v2416_v63  ;;  %v2423_v19 = vmul.f32 %v2391_v49, %v2332_v28  ;;  %v2395_v16 = vadd.f32 %v4449_v13, %v1816_v22  ;;  %v2387_v33 = vadd.f32 %v4441_v30, %v4191_v9  ;;  %v2394_v47 = vadd.f32 %v4447_v34, %v1815_v32  ;;  %v4541_v59 = vpop.f32.mrf.mxu2  ;;  %v3001_v49 = vld [vmem:[%s3124_s23 + $0x80] sm:$0xff]  ;;  %v3002_v22 = vld [vmem:[%s3124_s23 + $0x88] sm:$0xff] }
 0x3b2   : > { %2449 = vst [vmem:[%s4468_s19 + $0x8] sm:$0xff] %v2417_v3  ;;  %v2430_v25 = vmul.f32 %v2398_v18, %v2339_v51  ;;  %v2431_v63 = vmul.f32 %v2399_v35, %v2340_v54  ;;  %v2386_v9 = vadd.f32 %v4439_v38, %v4189_v14  ;;  %v1821_v8 = vmul.f32 %v4410_v61, %v4408_v62 }
 0x3b3   : > { %2456 = vst [vmem:[%s4468_s19 + $0x40] sm:$0xff] %v2424_v7  ;;  %v2273_v42 = vpop.permute.xlu1 %2272  ;;  %v2365_v7 = vrot.slane %v2364_v45, 2  ;;  %v1822_v14 = vmul.f32 %v4414_v58, %v4412_v56  ;;  %v1827_v58 = vmul.f32 %v1743_v11, %v1645_v31  ;;  %v2366_v31 = vsel %vm2016_vm7, %v4428_v41, %v4430_v39  ;;  %v3005_v39 = vld [vmem:[%s3124_s23 + $0xa0] sm:$0xff] }
 0x3b4   : > { %2457 = vst [vmem:[%s4468_s19 + $0x48] sm:$0xff] %v2425_v37  ;;  %v2335_v53 = vmul.f32 %v2997_v17, %v2273_v42  ;;  %v2336_v36 = vmul.f32 %v2998_v23, %v2273_v42  ;;  %v1694_v3 = vpop.f32.mrf.mxu3  ;;  %v1792_v37 = vpop.f32.mrf.mxu1  ;;  %v3004_v17 = vld [vmem:[%s3124_s23 + $0xb8] sm:$0xff]  ;;  %v1817_v11 = vmul.f32 %v4394_v44, %v4392_v29  ;;  %v1826_v41 = vmul.f32 %v4485_v0, %v4474_v55  ;;  %v3006_v29 = vld [vmem:[%s3124_s23 + $0x60] sm:$0xff]  ;;  %v3008_v55 = vld [vmem:[%s3124_s23 + $0xa8] sm:$0xff] }
 0x3b5   : > { %v2253_v2 = vpop.permute.xlu0 %2252  ;;  %2454 = vst [vmem:[%s4468_s19 + $0x30] sm:$0xff] %v2422_v24  ;;  %v4529_v60 = vperm.slane %v2365_v7, 0  ;;  %v4531_v15 = vperm.slane %v2365_v7, 1  ;;  %v4545_v42 = vpop.f32.mrf.mxu0  ;;  %v1828_v50 = vmul.f32 %v1792_v37, %v1694_v3 }
 0x3b6   : > { %v2327_v4 = vmul.f32 %v2999_v26, %v2253_v2  ;;  %v2328_v1 = vmul.f32 %v3000_v40, %v2253_v2  ;;  %2455 = vst [vmem:[%s4468_s19 + $0x38] sm:$0xff] %v2423_v19  ;;  %v2427_v10 = vmul.f32 %v2395_v16, %v2336_v36  ;;  %v2426_v46 = vmul.f32 %v2394_v47, %v2335_v53  ;;  %v2298_v26 = vpop.permute.xlu2 %2297 }
 0x3b7   : > { %2462 = vst [vmem:[%s4468_s19 + $0x70] sm:$0xff] %v2430_v25  ;;  %v2400_v28 = vadd.f32 %v4529_v60, %v1821_v8  ;;  %v2401_v18 = vadd.f32 %v4531_v15, %v1822_v14  ;;  %v2406_v24 = vadd.f32 %v4529_v60, %v1827_v58  ;;  %v2407_v19 = vadd.f32 %v4531_v15, %v1828_v50 }
 0x3b8   : > { %v2419_v30 = vmul.f32 %v2387_v33, %v2328_v1  ;;  %2463 = vst [vmem:[%s4468_s19 + $0x78] sm:$0xff] %v2431_v63  ;;  %v2418_v5 = vmul.f32 %v2386_v9, %v2327_v4  ;;  %v1818_v4 = vmul.f32 %v4398_v6, %v4396_v12  ;;  %v1825_v40 = vmul.f32 %v4472_v43, %v4470_v21 }
 0x3b9   : > { %2459 = vst [vmem:[%s4468_s19 + $0x58] sm:$0xff] %v2427_v10  ;;  %v1650_v23 = vpop.f32.mrf.mxu2  ;;  %v2367_v63 = vrot.slane %v2366_v31, 3  ;;  %v2345_v12 = vmul.f32 %v3005_v39, %v2298_v26  ;;  %v2346_v0 = vmul.f32 %v3008_v55, %v2298_v26  ;;  %v1829_v26 = vmul.f32 %v4545_v42, %v4541_v59 }
 0x3ba   : > { %2451 = vst [vmem:[%s4468_s19 + $0x18] sm:$0xff] %v2419_v30  ;;  %v2404_v10 = vadd.f32 %v4529_v60, %v1825_v40  ;;  %v2397_v21 = vadd.f32 %v4449_v13, %v1818_v4  ;;  %v3007_v30 = vld [vmem:[%s3124_s23 + $0x68] sm:$0xff]  ;;  %v3009_v13 = vld [vmem:[%s3124_s23 + $0xe0] sm:$0xff] }
 0x3bb   : > { %2450 = vst [vmem:[%s4468_s19 + $0x10] sm:$0xff] %v2418_v5  ;;  %v2405_v5 = vadd.f32 %v4531_v15, %v1826_v41  ;;  %v4578_v14 = vperm.slane %v2367_v63, 0  ;;  %v3016_v41 = vld [vmem:[%s3124_s23 + $0xc8] sm:$0xff] }
 0x3bc   : > { %2458 = vst [vmem:[%s4468_s19 + $0x50] sm:$0xff] %v2426_v46  ;;  %v4547_v62 = vpop.f32.mrf.mxu3  ;;  %v4549_v56 = vpop.f32.mrf.mxu1  ;;  %v2396_v46 = vadd.f32 %v4447_v34, %v1817_v11 }
 0x3bd   : > { %v1748_v2 = vpop.f32.mrf.mxu0  ;;  %v2437_v58 = vmul.f32 %v2405_v5, %v2346_v0  ;;  %v1830_v4 = vmul.f32 %v4549_v56, %v4547_v62 }
 0x3be   : > { %v1831_v34 = vmul.f32 %v1748_v2, %v1650_v23  ;;  %v3011_v23 = vld [vmem:[%s3124_s23 + $0x90] sm:$0xff] }
 0x3bf   : > { %v2288_v38 = vpop.permute.xlu1 %2287  ;;  %2469 = vst [vmem:[%s4468_s19 + $0xa8] sm:$0xff] %v2437_v58 }
 0x3c0   : > { %v2341_v32 = vmul.f32 %v3001_v49, %v2288_v38  ;;  %v2342_v35 = vmul.f32 %v3002_v22, %v2288_v38  ;;  %v2375_v49 = vperm.slane %v2367_v63, 1  ;;  %v2408_v63 = vadd.f32 %v4578_v14, %v1829_v26 }
 0x3c1   : > { %v1653_v1 = vpop.f32.mrf.mxu2 }
 0x3c2   : > { %v2432_v61 = vmul.f32 %v2400_v28, %v2341_v32  ;;  %v2433_v45 = vmul.f32 %v2401_v18, %v2342_v35  ;;  %v3010_v32 = vld [vmem:[%s3124_s23 + $0xe8] sm:$0xff]  ;;  %v2436_v35 = vmul.f32 %v2404_v10, %v2345_v12 }
 0x3c4   : > { %2464 = vst [vmem:[%s4468_s19 + $0x80] sm:$0xff] %v2432_v61  ;;  %v1699_v25 = vpop.f32.mrf.mxu3  ;;  %v1797_v33 = vpop.f32.mrf.mxu1 }
 0x3c5   : > { %2465 = vst [vmem:[%s4468_s19 + $0x88] sm:$0xff] %v2433_v45  ;;  %v1751_v3 = vpop.f32.mrf.mxu0  ;;  %v1823_v45 = vmul.f32 %v4424_v52, %v4422_v48  ;;  %v1832_v50 = vmul.f32 %v1797_v33, %v1699_v25 }
 0x3c6   : > { %v1833_v9 = vmul.f32 %v1751_v3, %v1653_v1  ;;  %2468 = vst [vmem:[%s4468_s19 + $0xa0] sm:$0xff] %v2436_v35  ;;  %v2409_v3 = vadd.f32 %v2375_v49, %v1830_v4 }
 0x3c7   : > { %v2303_v51 = vpop.permute.xlu1 %2302 }
 0x3c8   : > { %v2347_v54 = vmul.f32 %v3003_v20, %v2303_v51  ;;  %v2348_v53 = vmul.f32 %v3004_v17, %v2303_v51  ;;  %v2412_v61 = vadd.f32 %v4578_v14, %v1833_v9  ;;  %v2402_v20 = vadd.f32 %v4529_v60, %v1823_v45  ;;  %v3013_v60 = vld [vmem:[%s3124_s23 + $0xd0] sm:$0xff] }
 0x3c9   : > { %v1655_v56 = vpop.f32.mrf.mxu2 }
 0x3ca   : > { %v2438_v36 = vmul.f32 %v2406_v24, %v2347_v54  ;;  %v2439_v16 = vmul.f32 %v2407_v19, %v2348_v53  ;;  %v1824_v24 = vmul.f32 %v4432_v27, %v4426_v57  ;;  %v2313_v54 = vpop.permute.xlu2 %2312  ;;  %v2410_v53 = vadd.f32 %v4578_v14, %v1831_v34  ;;  %v3012_v57 = vld [vmem:[%s3124_s23 + $0x98] sm:$0xff] }
 0x3cb   : > { %v2351_v2 = vmul.f32 %v3013_v60, %v2313_v54 }
 0x3cc   : > { %2470 = vst [vmem:[%s4468_s19 + $0xb0] sm:$0xff] %v2438_v36  ;;  %v1702_v47 = vpop.f32.mrf.mxu3  ;;  %v1800_v7 = vpop.f32.mrf.mxu1  ;;  %v2403_v52 = vadd.f32 %v4531_v15, %v1824_v24  ;;  %v3014_v15 = vld [vmem:[%s3124_s23 + $0xd8] sm:$0xff] }
 0x3cd   : > { %2471 = vst [vmem:[%s4468_s19 + $0xb8] sm:$0xff] %v2439_v16  ;;  %v1834_v8 = vmul.f32 %v1800_v7, %v1702_v47  ;;  %v2411_v16 = vadd.f32 %v2375_v49, %v1832_v50  ;;  %v2352_v31 = vmul.f32 %v3014_v15, %v2313_v54  ;;  %v2442_v40 = vmul.f32 %v2410_v53, %v2351_v2  ;;  %v3015_v47 = vld [vmem:[%s3124_s23 + $0xc0] sm:$0xff]  ;;  %v1753_v12 = vpop.f32.mrf.mxu0 }
 0x3cf   : > { %v2318_v6 = vpop.permute.xlu1 %2317  ;;  %v2413_v51 = vadd.f32 %v2375_v49, %v1834_v8  ;;  %v2443_v1 = vmul.f32 %v2411_v16, %v2352_v31  ;;  %2474 = vst [vmem:[%s4468_s19 + $0xd0] sm:$0xff] %v2442_v40 }
 0x3d0   : > { %v2353_v38 = vmul.f32 %v3009_v13, %v2318_v6  ;;  %v2354_v22 = vmul.f32 %v3010_v32, %v2318_v6 }
 0x3d1   : > { %2475 = vst [vmem:[%s4468_s19 + $0xd8] sm:$0xff] %v2443_v1 }
 0x3d2   : > { %v2444_v19 = vmul.f32 %v2412_v61, %v2353_v38  ;;  %v2445_v17 = vmul.f32 %v2413_v51, %v2354_v22 }
 0x3d4   : > { %2476 = vst [vmem:[%s4468_s19 + $0xe0] sm:$0xff] %v2444_v19  ;;  %v1704_v39 = vpop.f32.mrf.mxu3  ;;  %v1802_v6 = vpop.f32.mrf.mxu1 }
 0x3d5   : > { %2477 = vst [vmem:[%s4468_s19 + $0xe8] sm:$0xff] %v2445_v17 }
 0x3d6   : > { %v2278_v43 = vpop.permute.xlu0 %2277 }
 0x3d7   : > { %v2337_v44 = vmul.f32 %v3006_v29, %v2278_v43  ;;  %v2338_v37 = vmul.f32 %v3007_v30, %v2278_v43  ;;  %v1836_v43 = vmul.f32 %v1802_v6, %v1704_v39 }
 0x3d9   : > { %v2428_v28 = vmul.f32 %v2396_v46, %v2337_v44  ;;  %v2429_v18 = vmul.f32 %v2397_v21, %v2338_v37  ;;  %v1835_v21 = vmul.f32 %v1753_v12, %v1655_v56  ;;  %v2415_v29 = vadd.f32 %v2375_v49, %v1836_v43  ;;  %v3017_v44 = vld [vmem:[%s3124_s23 + $0xf0] sm:$0xff]  ;;  %v3018_v37 = vld [vmem:[%s3124_s23 + $0xf8] sm:$0xff] }
 0x3db   : > { %2460 = vst [vmem:[%s4468_s19 + $0x60] sm:$0xff] %v2428_v28  ;;  %v2414_v9 = vadd.f32 %v4578_v14, %v1835_v21 }
 0x3dc   : > { %2461 = vst [vmem:[%s4468_s19 + $0x68] sm:$0xff] %v2429_v18 }
 0x3de   : > { %v2293_v48 = vpop.permute.xlu0 %2292 }
 0x3df   : > { %v2343_v36 = vmul.f32 %v3011_v23, %v2293_v48  ;;  %v2344_v27 = vmul.f32 %v3012_v57, %v2293_v48 }
 0x3e1   : > { %v2434_v25 = vmul.f32 %v2402_v20, %v2343_v36  ;;  %v2435_v33 = vmul.f32 %v2403_v52, %v2344_v27 }
 0x3e3   : > { %2466 = vst [vmem:[%s4468_s19 + $0x90] sm:$0xff] %v2434_v25 }
 0x3e4   : > { %2467 = vst [vmem:[%s4468_s19 + $0x98] sm:$0xff] %v2435_v33 }
 0x3e6   : > { %v2308_v11 = vpop.permute.xlu0 %2307 }
 0x3e7   : > { %v2349_v10 = vmul.f32 %v3015_v47, %v2308_v11  ;;  %v2350_v59 = vmul.f32 %v3016_v41, %v2308_v11 }
 0x3e9   : > { %v2440_v42 = vmul.f32 %v2408_v63, %v2349_v10  ;;  %v2441_v62 = vmul.f32 %v2409_v3, %v2350_v59 }
 0x3eb   : > { %2472 = vst [vmem:[%s4468_s19 + $0xc0] sm:$0xff] %v2440_v42 }
 0x3ec   : > { %2473 = vst [vmem:[%s4468_s19 + $0xc8] sm:$0xff] %v2441_v62 }
 0x3ef   : > { %v2323_v7 = vpop.permute.xlu0 %2322 }
 0x3f0   : > { %v2355_v30 = vmul.f32 %v3017_v44, %v2323_v7  ;;  %v2356_v46 = vmul.f32 %v3018_v37, %v2323_v7 }
 0x3f2   : > { %v2446_v5 = vmul.f32 %v2414_v9, %v2355_v30  ;;  %v2447_v55 = vmul.f32 %v2415_v29, %v2356_v46 }
 0x3f4   : > { %2478 = vst [vmem:[%s4468_s19 + $0xf0] sm:$0xff] %v2446_v5 }
 0x3f5   : > { %2479 = vst [vmem:[%s4468_s19 + $0xf8] sm:$0xff] %v2447_v55 }
 0x3f6 PF: > { %s18_s27 = sadd.s32 1, %s3025_s27  }
 0x3f7   : > { %p15_p4 = scmp.ge.s32.totalorder %s18_s27, 4  }
 0x3f9   :  { %17 = sbr.rel (!%p15_p4) target bundleno = 1 (0x1), region = 90 }

</bundles_post_ra>
